<compile_context>
chip_gen: v6e
topology: v6e:2x2x1
jax: 0.10.0
libtpu: 0.0.40
codegen_flags: <defaults>
</compile_context>

<pallas_src>
import jax
import jax.numpy as jnp
from jax.experimental import pallas as pl
from jax.experimental.pallas import tpu as pltpu

# (fan_in, fan_out) of the four torch.nn.Linear layers.
_DIMS = ((8, 6), (6, 4), (4, 2), (2, 1))
_N_PARAMS = sum(i * o + o for i, o in _DIMS)   # 95 floats total


def _softplus(x):
    # Matches torch.nn.Softplus(beta=1, threshold=20).
    safe = jnp.minimum(x, 20.0)
    return jnp.where(x > 20.0, x, jnp.log1p(jnp.exp(safe)))


def _sigmoid(x):
    return 1.0 / (1.0 + jnp.exp(-x))


def mlp_kernel(p_ref, x_ref, o_ref):
    """p_ref: (95,) f32 in SMEM.  x_ref: (8, R, 128) block.  o_ref: (R, 128)."""
    # Per-feature channel slabs; the batch is fully dense inside each slab.
    acts = [x_ref[i].astype(jnp.float32) for i in range(_DIMS[0][0])]

    off = 0
    n_layers = len(_DIMS)
    for li, (n_in, n_out) in enumerate(_DIMS):
        w_off = off                    # n_out x n_in weights, (out, in) row-major
        b_off = off + n_in * n_out     # n_out biases
        nxt = []
        for o in range(n_out):
            # Unrolled VPU mul-add chain: SMEM scalar weight broadcast * slab.
            z = acts[0] * p_ref[w_off + o * n_in]
            for i in range(1, n_in):
                z = z + acts[i] * p_ref[w_off + o * n_in + i]
            z = z + p_ref[b_off + o]
            nxt.append(_softplus(z) if li + 1 < n_layers else _sigmoid(z))
        acts = nxt
        off = b_off + n_out

    o_ref[...] = acts[0].astype(o_ref.dtype)


def _pack_params(params):
    """Pack w1..w4 / b1..b4 into one flat f32 vector, weights as (out, in)."""
    parts = []
    for i, (n_in, n_out) in enumerate(_DIMS, start=1):
        w = params[f"w{i}"]            # (n_in, n_out):  y = x @ w + b
        b = params[f"b{i}"]            # (1, n_out)
        parts.append(jnp.transpose(w).reshape(-1))   # (out, in), row-major
        parts.append(b.reshape(-1))
    packed = jnp.concatenate(parts).astype(jnp.float32)
    assert packed.shape == (_N_PARAMS,)
    return packed


def _round_up(x, m):
    return (x + m - 1) // m * m


@jax.jit
def diabetes_model_forward(x, params):
    """x: (B, 8) f32 (or bf16).  params: dict w1..w4 (in,out), b1..b4 (1,out)."""
    B, F = x.shape
    assert F == _DIMS[0][0]

    packed = _pack_params(params)

    # Pad the batch to a multiple of 1024 rows (8 sublanes x 128 lanes) and
    # pick the largest tile in {8192, 4096, 2048, 1024} that divides it.
    b_pad = _round_up(B, 1024)
    for cand in (8192, 4096, 2048):
        if b_pad % cand == 0:
            tile_b = cand
            break
    else:
        tile_b = 1024
    rows = b_pad // 128          # total (., 128) output rows
    r = tile_b // 128            # rows per grid step (multiple of 8)
    grid = (b_pad // tile_b,)

    # Lane-dense layout: element (c, j, k) is feature c of batch row j*128 + k.
    xp = jnp.pad(x, ((0, b_pad - B), (0, 0)))
    xr = xp.T.reshape(F, rows, 128)

    out = pl.pallas_call(
        mlp_kernel,
        out_shape=jax.ShapeDtypeStruct((rows, 128), jnp.float32),
        grid=grid,
        in_specs=[
            # Whole packed parameter vector, resident in SMEM across the grid.
            pl.BlockSpec(memory_space=pltpu.MemorySpace.SMEM),
            pl.BlockSpec((F, r, 128), lambda g: (0, g, 0)),
        ],
        out_specs=pl.BlockSpec((r, 128), lambda g: (g, 0)),
        compiler_params=pltpu.CompilerParams(
            dimension_semantics=("parallel",)),
        cost_estimate=pl.CostEstimate(
            flops=180 * b_pad,                 # ~82 MACs + bias/act adds per row
            transcendentals=25 * b_pad,        # softplus exps/logs + sigmoid
            bytes_accessed=(F + 1) * 4 * b_pad + 4 * _N_PARAMS),
    )(packed, xr)

    # Back to the PyTorch (B, 1) convention; padded rows are independent and
    # simply dropped here.
    return out.reshape(b_pad, 1)[:B]


def init_params(key):
    """Deterministic init mimicking torch.nn.Linear (uniform +/- 1/sqrt(fan_in))."""
    params = {}
    for i, (fan_in, fan_out) in enumerate(_DIMS, start=1):
        key, kw, kb = jax.random.split(key, 3)
        bound = 1.0 / float(fan_in) ** 0.5
        params[f"w{i}"] = jax.random.uniform(
            kw, (fan_in, fan_out), jnp.float32, minval=-bound, maxval=bound)
        params[f"b{i}"] = jax.random.uniform(
            kb, (1, fan_out), jnp.float32, minval=-bound, maxval=bound)
    return params


def reference_forward(x, params):
    hp = jax.lax.Precision.HIGHEST
    h = x.astype(jnp.float32)
    for i in range(1, 5):
        h = jnp.dot(h, params[f"w{i}"], precision=hp) + params[f"b{i}"]
        if i < 4:
            h = jnp.where(h > 20.0, h, jnp.log1p(jnp.exp(jnp.minimum(h, 20.0))))
    return 1.0 / (1.0 + jnp.exp(-h))


if __name__ == "__main__":
    key = jax.random.PRNGKey(0)
    kx, kp = jax.random.split(key)

    B = 6000   # deliberately not a tile multiple -> exercises padding + 3-step grid
    x = jax.random.normal(kx, (B, 8), jnp.float32)
    params = init_params(kp)

    out = jax.block_until_ready(diabetes_model_forward(x, params))
    ref = reference_forward(x, params)

    assert out.shape == (B, 1), out.shape
    assert jnp.allclose(out, ref, atol=1e-5, rtol=1e-5), \
        float(jnp.max(jnp.abs(out - ref)))

    print("KERNEL_OK")
</pallas_src>

<mosaic_0001>
module attributes {stable_mosaic.version = 11 : i64} {
  func.func @mlp_kernel(%arg0: i32, %arg1: memref<95xf32, #tpu.memory_space<smem>>, %arg2: memref<8x16x128xf32, #tpu.memory_space<vmem>>, %arg3: memref<16x128xf32, #tpu.memory_space<vmem>>) attributes {dimension_semantics = [#tpu.dimension_semantics<parallel>], iteration_bounds = array<i64: 3>, scalar_prefetch = 0 : i64, scratch_operands = 0 : i64, tpu.core_type = #tpu.core_type<tc>, window_params = [{transform_indices = @transform_0, window_bounds = array<i64: 95>}, {transform_indices = @transform_1, window_bounds = array<i64: 8, 16, 128>}, {transform_indices = @transform_2, window_bounds = array<i64: 16, 128>}]} {
    %c0 = arith.constant 0 : index
    %c0_0 = arith.constant 0 : index
    %c0_1 = arith.constant 0 : index
    %0 = vector.load %arg2[%c0, %c0_0, %c0_1] : memref<8x16x128xf32, #tpu.memory_space<vmem>>, vector<1x16x128xf32>
    %1 = vector.shape_cast %0 : vector<1x16x128xf32> to vector<16x128xf32>
    %c1 = arith.constant 1 : index
    %c0_2 = arith.constant 0 : index
    %c0_3 = arith.constant 0 : index
    %2 = vector.load %arg2[%c1, %c0_2, %c0_3] : memref<8x16x128xf32, #tpu.memory_space<vmem>>, vector<1x16x128xf32>
    %3 = vector.shape_cast %2 : vector<1x16x128xf32> to vector<16x128xf32>
    %c2 = arith.constant 2 : index
    %c0_4 = arith.constant 0 : index
    %c0_5 = arith.constant 0 : index
    %4 = vector.load %arg2[%c2, %c0_4, %c0_5] : memref<8x16x128xf32, #tpu.memory_space<vmem>>, vector<1x16x128xf32>
    %5 = vector.shape_cast %4 : vector<1x16x128xf32> to vector<16x128xf32>
    %c3 = arith.constant 3 : index
    %c0_6 = arith.constant 0 : index
    %c0_7 = arith.constant 0 : index
    %6 = vector.load %arg2[%c3, %c0_6, %c0_7] : memref<8x16x128xf32, #tpu.memory_space<vmem>>, vector<1x16x128xf32>
    %7 = vector.shape_cast %6 : vector<1x16x128xf32> to vector<16x128xf32>
    %c4 = arith.constant 4 : index
    %c0_8 = arith.constant 0 : index
    %c0_9 = arith.constant 0 : index
    %8 = vector.load %arg2[%c4, %c0_8, %c0_9] : memref<8x16x128xf32, #tpu.memory_space<vmem>>, vector<1x16x128xf32>
    %9 = vector.shape_cast %8 : vector<1x16x128xf32> to vector<16x128xf32>
    %c5 = arith.constant 5 : index
    %c0_10 = arith.constant 0 : index
    %c0_11 = arith.constant 0 : index
    %10 = vector.load %arg2[%c5, %c0_10, %c0_11] : memref<8x16x128xf32, #tpu.memory_space<vmem>>, vector<1x16x128xf32>
    %11 = vector.shape_cast %10 : vector<1x16x128xf32> to vector<16x128xf32>
    %c6 = arith.constant 6 : index
    %c0_12 = arith.constant 0 : index
    %c0_13 = arith.constant 0 : index
    %12 = vector.load %arg2[%c6, %c0_12, %c0_13] : memref<8x16x128xf32, #tpu.memory_space<vmem>>, vector<1x16x128xf32>
    %13 = vector.shape_cast %12 : vector<1x16x128xf32> to vector<16x128xf32>
    %c7 = arith.constant 7 : index
    %c0_14 = arith.constant 0 : index
    %c0_15 = arith.constant 0 : index
    %14 = vector.load %arg2[%c7, %c0_14, %c0_15] : memref<8x16x128xf32, #tpu.memory_space<vmem>>, vector<1x16x128xf32>
    %15 = vector.shape_cast %14 : vector<1x16x128xf32> to vector<16x128xf32>
    %c0_16 = arith.constant 0 : index
    %16 = memref.load %arg1[%c0_16] : memref<95xf32, #tpu.memory_space<smem>>
    %17 = vector.broadcast %16 : f32 to vector<16x128xf32>
    %18 = arith.mulf %1, %17 : vector<16x128xf32>
    %c1_17 = arith.constant 1 : index
    %19 = memref.load %arg1[%c1_17] : memref<95xf32, #tpu.memory_space<smem>>
    %20 = vector.broadcast %19 : f32 to vector<16x128xf32>
    %21 = arith.mulf %3, %20 : vector<16x128xf32>
    %22 = arith.addf %18, %21 : vector<16x128xf32>
    %c2_18 = arith.constant 2 : index
    %23 = memref.load %arg1[%c2_18] : memref<95xf32, #tpu.memory_space<smem>>
    %24 = vector.broadcast %23 : f32 to vector<16x128xf32>
    %25 = arith.mulf %5, %24 : vector<16x128xf32>
    %26 = arith.addf %22, %25 : vector<16x128xf32>
    %c3_19 = arith.constant 3 : index
    %27 = memref.load %arg1[%c3_19] : memref<95xf32, #tpu.memory_space<smem>>
    %28 = vector.broadcast %27 : f32 to vector<16x128xf32>
    %29 = arith.mulf %7, %28 : vector<16x128xf32>
    %30 = arith.addf %26, %29 : vector<16x128xf32>
    %c4_20 = arith.constant 4 : index
    %31 = memref.load %arg1[%c4_20] : memref<95xf32, #tpu.memory_space<smem>>
    %32 = vector.broadcast %31 : f32 to vector<16x128xf32>
    %33 = arith.mulf %9, %32 : vector<16x128xf32>
    %34 = arith.addf %30, %33 : vector<16x128xf32>
    %c5_21 = arith.constant 5 : index
    %35 = memref.load %arg1[%c5_21] : memref<95xf32, #tpu.memory_space<smem>>
    %36 = vector.broadcast %35 : f32 to vector<16x128xf32>
    %37 = arith.mulf %11, %36 : vector<16x128xf32>
    %38 = arith.addf %34, %37 : vector<16x128xf32>
    %c6_22 = arith.constant 6 : index
    %39 = memref.load %arg1[%c6_22] : memref<95xf32, #tpu.memory_space<smem>>
    %40 = vector.broadcast %39 : f32 to vector<16x128xf32>
    %41 = arith.mulf %13, %40 : vector<16x128xf32>
    %42 = arith.addf %38, %41 : vector<16x128xf32>
    %c7_23 = arith.constant 7 : index
    %43 = memref.load %arg1[%c7_23] : memref<95xf32, #tpu.memory_space<smem>>
    %44 = vector.broadcast %43 : f32 to vector<16x128xf32>
    %45 = arith.mulf %15, %44 : vector<16x128xf32>
    %46 = arith.addf %42, %45 : vector<16x128xf32>
    %c48 = arith.constant 48 : index
    %47 = memref.load %arg1[%c48] : memref<95xf32, #tpu.memory_space<smem>>
    %48 = vector.broadcast %47 : f32 to vector<16x128xf32>
    %49 = arith.addf %46, %48 : vector<16x128xf32>
    %cst = arith.constant 2.000000e+01 : f32
    %50 = vector.broadcast %cst : f32 to vector<16x128xf32>
    %51 = arith.minimumf %49, %50 : vector<16x128xf32>
    %cst_24 = arith.constant 2.000000e+01 : f32
    %52 = vector.broadcast %cst_24 : f32 to vector<16x128xf32>
    %53 = arith.cmpf ogt, %49, %52 : vector<16x128xf32>
    %54 = math.exp %51 : vector<16x128xf32>
    %55 = math.log1p %54 : vector<16x128xf32>
    %56 = arith.select %53, %49, %55 : vector<16x128xi1>, vector<16x128xf32>
    %c8 = arith.constant 8 : index
    %57 = memref.load %arg1[%c8] : memref<95xf32, #tpu.memory_space<smem>>
    %58 = vector.broadcast %57 : f32 to vector<16x128xf32>
    %59 = arith.mulf %1, %58 : vector<16x128xf32>
    %c9 = arith.constant 9 : index
    %60 = memref.load %arg1[%c9] : memref<95xf32, #tpu.memory_space<smem>>
    %61 = vector.broadcast %60 : f32 to vector<16x128xf32>
    %62 = arith.mulf %3, %61 : vector<16x128xf32>
    %63 = arith.addf %59, %62 : vector<16x128xf32>
    %c10 = arith.constant 10 : index
    %64 = memref.load %arg1[%c10] : memref<95xf32, #tpu.memory_space<smem>>
    %65 = vector.broadcast %64 : f32 to vector<16x128xf32>
    %66 = arith.mulf %5, %65 : vector<16x128xf32>
    %67 = arith.addf %63, %66 : vector<16x128xf32>
    %c11 = arith.constant 11 : index
    %68 = memref.load %arg1[%c11] : memref<95xf32, #tpu.memory_space<smem>>
    %69 = vector.broadcast %68 : f32 to vector<16x128xf32>
    %70 = arith.mulf %7, %69 : vector<16x128xf32>
    %71 = arith.addf %67, %70 : vector<16x128xf32>
    %c12 = arith.constant 12 : index
    %72 = memref.load %arg1[%c12] : memref<95xf32, #tpu.memory_space<smem>>
    %73 = vector.broadcast %72 : f32 to vector<16x128xf32>
    %74 = arith.mulf %9, %73 : vector<16x128xf32>
    %75 = arith.addf %71, %74 : vector<16x128xf32>
    %c13 = arith.constant 13 : index
    %76 = memref.load %arg1[%c13] : memref<95xf32, #tpu.memory_space<smem>>
    %77 = vector.broadcast %76 : f32 to vector<16x128xf32>
    %78 = arith.mulf %11, %77 : vector<16x128xf32>
    %79 = arith.addf %75, %78 : vector<16x128xf32>
    %c14 = arith.constant 14 : index
    %80 = memref.load %arg1[%c14] : memref<95xf32, #tpu.memory_space<smem>>
    %81 = vector.broadcast %80 : f32 to vector<16x128xf32>
    %82 = arith.mulf %13, %81 : vector<16x128xf32>
    %83 = arith.addf %79, %82 : vector<16x128xf32>
    %c15 = arith.constant 15 : index
    %84 = memref.load %arg1[%c15] : memref<95xf32, #tpu.memory_space<smem>>
    %85 = vector.broadcast %84 : f32 to vector<16x128xf32>
    %86 = arith.mulf %15, %85 : vector<16x128xf32>
    %87 = arith.addf %83, %86 : vector<16x128xf32>
    %c49 = arith.constant 49 : index
    %88 = memref.load %arg1[%c49] : memref<95xf32, #tpu.memory_space<smem>>
    %89 = vector.broadcast %88 : f32 to vector<16x128xf32>
    %90 = arith.addf %87, %89 : vector<16x128xf32>
    %cst_25 = arith.constant 2.000000e+01 : f32
    %91 = vector.broadcast %cst_25 : f32 to vector<16x128xf32>
    %92 = arith.minimumf %90, %91 : vector<16x128xf32>
    %cst_26 = arith.constant 2.000000e+01 : f32
    %93 = vector.broadcast %cst_26 : f32 to vector<16x128xf32>
    %94 = arith.cmpf ogt, %90, %93 : vector<16x128xf32>
    %95 = math.exp %92 : vector<16x128xf32>
    %96 = math.log1p %95 : vector<16x128xf32>
    %97 = arith.select %94, %90, %96 : vector<16x128xi1>, vector<16x128xf32>
    %c16 = arith.constant 16 : index
    %98 = memref.load %arg1[%c16] : memref<95xf32, #tpu.memory_space<smem>>
    %99 = vector.broadcast %98 : f32 to vector<16x128xf32>
    %100 = arith.mulf %1, %99 : vector<16x128xf32>
    %c17 = arith.constant 17 : index
    %101 = memref.load %arg1[%c17] : memref<95xf32, #tpu.memory_space<smem>>
    %102 = vector.broadcast %101 : f32 to vector<16x128xf32>
    %103 = arith.mulf %3, %102 : vector<16x128xf32>
    %104 = arith.addf %100, %103 : vector<16x128xf32>
    %c18 = arith.constant 18 : index
    %105 = memref.load %arg1[%c18] : memref<95xf32, #tpu.memory_space<smem>>
    %106 = vector.broadcast %105 : f32 to vector<16x128xf32>
    %107 = arith.mulf %5, %106 : vector<16x128xf32>
    %108 = arith.addf %104, %107 : vector<16x128xf32>
    %c19 = arith.constant 19 : index
    %109 = memref.load %arg1[%c19] : memref<95xf32, #tpu.memory_space<smem>>
    %110 = vector.broadcast %109 : f32 to vector<16x128xf32>
    %111 = arith.mulf %7, %110 : vector<16x128xf32>
    %112 = arith.addf %108, %111 : vector<16x128xf32>
    %c20 = arith.constant 20 : index
    %113 = memref.load %arg1[%c20] : memref<95xf32, #tpu.memory_space<smem>>
    %114 = vector.broadcast %113 : f32 to vector<16x128xf32>
    %115 = arith.mulf %9, %114 : vector<16x128xf32>
    %116 = arith.addf %112, %115 : vector<16x128xf32>
    %c21 = arith.constant 21 : index
    %117 = memref.load %arg1[%c21] : memref<95xf32, #tpu.memory_space<smem>>
    %118 = vector.broadcast %117 : f32 to vector<16x128xf32>
    %119 = arith.mulf %11, %118 : vector<16x128xf32>
    %120 = arith.addf %116, %119 : vector<16x128xf32>
    %c22 = arith.constant 22 : index
    %121 = memref.load %arg1[%c22] : memref<95xf32, #tpu.memory_space<smem>>
    %122 = vector.broadcast %121 : f32 to vector<16x128xf32>
    %123 = arith.mulf %13, %122 : vector<16x128xf32>
    %124 = arith.addf %120, %123 : vector<16x128xf32>
    %c23 = arith.constant 23 : index
    %125 = memref.load %arg1[%c23] : memref<95xf32, #tpu.memory_space<smem>>
    %126 = vector.broadcast %125 : f32 to vector<16x128xf32>
    %127 = arith.mulf %15, %126 : vector<16x128xf32>
    %128 = arith.addf %124, %127 : vector<16x128xf32>
    %c50 = arith.constant 50 : index
    %129 = memref.load %arg1[%c50] : memref<95xf32, #tpu.memory_space<smem>>
    %130 = vector.broadcast %129 : f32 to vector<16x128xf32>
    %131 = arith.addf %128, %130 : vector<16x128xf32>
    %cst_27 = arith.constant 2.000000e+01 : f32
    %132 = vector.broadcast %cst_27 : f32 to vector<16x128xf32>
    %133 = arith.minimumf %131, %132 : vector<16x128xf32>
    %cst_28 = arith.constant 2.000000e+01 : f32
    %134 = vector.broadcast %cst_28 : f32 to vector<16x128xf32>
    %135 = arith.cmpf ogt, %131, %134 : vector<16x128xf32>
    %136 = math.exp %133 : vector<16x128xf32>
    %137 = math.log1p %136 : vector<16x128xf32>
    %138 = arith.select %135, %131, %137 : vector<16x128xi1>, vector<16x128xf32>
    %c24 = arith.constant 24 : index
    %139 = memref.load %arg1[%c24] : memref<95xf32, #tpu.memory_space<smem>>
    %140 = vector.broadcast %139 : f32 to vector<16x128xf32>
    %141 = arith.mulf %1, %140 : vector<16x128xf32>
    %c25 = arith.constant 25 : index
    %142 = memref.load %arg1[%c25] : memref<95xf32, #tpu.memory_space<smem>>
    %143 = vector.broadcast %142 : f32 to vector<16x128xf32>
    %144 = arith.mulf %3, %143 : vector<16x128xf32>
    %145 = arith.addf %141, %144 : vector<16x128xf32>
    %c26 = arith.constant 26 : index
    %146 = memref.load %arg1[%c26] : memref<95xf32, #tpu.memory_space<smem>>
    %147 = vector.broadcast %146 : f32 to vector<16x128xf32>
    %148 = arith.mulf %5, %147 : vector<16x128xf32>
    %149 = arith.addf %145, %148 : vector<16x128xf32>
    %c27 = arith.constant 27 : index
    %150 = memref.load %arg1[%c27] : memref<95xf32, #tpu.memory_space<smem>>
    %151 = vector.broadcast %150 : f32 to vector<16x128xf32>
    %152 = arith.mulf %7, %151 : vector<16x128xf32>
    %153 = arith.addf %149, %152 : vector<16x128xf32>
    %c28 = arith.constant 28 : index
    %154 = memref.load %arg1[%c28] : memref<95xf32, #tpu.memory_space<smem>>
    %155 = vector.broadcast %154 : f32 to vector<16x128xf32>
    %156 = arith.mulf %9, %155 : vector<16x128xf32>
    %157 = arith.addf %153, %156 : vector<16x128xf32>
    %c29 = arith.constant 29 : index
    %158 = memref.load %arg1[%c29] : memref<95xf32, #tpu.memory_space<smem>>
    %159 = vector.broadcast %158 : f32 to vector<16x128xf32>
    %160 = arith.mulf %11, %159 : vector<16x128xf32>
    %161 = arith.addf %157, %160 : vector<16x128xf32>
    %c30 = arith.constant 30 : index
    %162 = memref.load %arg1[%c30] : memref<95xf32, #tpu.memory_space<smem>>
    %163 = vector.broadcast %162 : f32 to vector<16x128xf32>
    %164 = arith.mulf %13, %163 : vector<16x128xf32>
    %165 = arith.addf %161, %164 : vector<16x128xf32>
    %c31 = arith.constant 31 : index
    %166 = memref.load %arg1[%c31] : memref<95xf32, #tpu.memory_space<smem>>
    %167 = vector.broadcast %166 : f32 to vector<16x128xf32>
    %168 = arith.mulf %15, %167 : vector<16x128xf32>
    %169 = arith.addf %165, %168 : vector<16x128xf32>
    %c51 = arith.constant 51 : index
    %170 = memref.load %arg1[%c51] : memref<95xf32, #tpu.memory_space<smem>>
    %171 = vector.broadcast %170 : f32 to vector<16x128xf32>
    %172 = arith.addf %169, %171 : vector<16x128xf32>
    %cst_29 = arith.constant 2.000000e+01 : f32
    %173 = vector.broadcast %cst_29 : f32 to vector<16x128xf32>
    %174 = arith.minimumf %172, %173 : vector<16x128xf32>
    %cst_30 = arith.constant 2.000000e+01 : f32
    %175 = vector.broadcast %cst_30 : f32 to vector<16x128xf32>
    %176 = arith.cmpf ogt, %172, %175 : vector<16x128xf32>
    %177 = math.exp %174 : vector<16x128xf32>
    %178 = math.log1p %177 : vector<16x128xf32>
    %179 = arith.select %176, %172, %178 : vector<16x128xi1>, vector<16x128xf32>
    %c32 = arith.constant 32 : index
    %180 = memref.load %arg1[%c32] : memref<95xf32, #tpu.memory_space<smem>>
    %181 = vector.broadcast %180 : f32 to vector<16x128xf32>
    %182 = arith.mulf %1, %181 : vector<16x128xf32>
    %c33 = arith.constant 33 : index
    %183 = memref.load %arg1[%c33] : memref<95xf32, #tpu.memory_space<smem>>
    %184 = vector.broadcast %183 : f32 to vector<16x128xf32>
    %185 = arith.mulf %3, %184 : vector<16x128xf32>
    %186 = arith.addf %182, %185 : vector<16x128xf32>
    %c34 = arith.constant 34 : index
    %187 = memref.load %arg1[%c34] : memref<95xf32, #tpu.memory_space<smem>>
    %188 = vector.broadcast %187 : f32 to vector<16x128xf32>
    %189 = arith.mulf %5, %188 : vector<16x128xf32>
    %190 = arith.addf %186, %189 : vector<16x128xf32>
    %c35 = arith.constant 35 : index
    %191 = memref.load %arg1[%c35] : memref<95xf32, #tpu.memory_space<smem>>
    %192 = vector.broadcast %191 : f32 to vector<16x128xf32>
    %193 = arith.mulf %7, %192 : vector<16x128xf32>
    %194 = arith.addf %190, %193 : vector<16x128xf32>
    %c36 = arith.constant 36 : index
    %195 = memref.load %arg1[%c36] : memref<95xf32, #tpu.memory_space<smem>>
    %196 = vector.broadcast %195 : f32 to vector<16x128xf32>
    %197 = arith.mulf %9, %196 : vector<16x128xf32>
    %198 = arith.addf %194, %197 : vector<16x128xf32>
    %c37 = arith.constant 37 : index
    %199 = memref.load %arg1[%c37] : memref<95xf32, #tpu.memory_space<smem>>
    %200 = vector.broadcast %199 : f32 to vector<16x128xf32>
    %201 = arith.mulf %11, %200 : vector<16x128xf32>
    %202 = arith.addf %198, %201 : vector<16x128xf32>
    %c38 = arith.constant 38 : index
    %203 = memref.load %arg1[%c38] : memref<95xf32, #tpu.memory_space<smem>>
    %204 = vector.broadcast %203 : f32 to vector<16x128xf32>
    %205 = arith.mulf %13, %204 : vector<16x128xf32>
    %206 = arith.addf %202, %205 : vector<16x128xf32>
    %c39 = arith.constant 39 : index
    %207 = memref.load %arg1[%c39] : memref<95xf32, #tpu.memory_space<smem>>
    %208 = vector.broadcast %207 : f32 to vector<16x128xf32>
    %209 = arith.mulf %15, %208 : vector<16x128xf32>
    %210 = arith.addf %206, %209 : vector<16x128xf32>
    %c52 = arith.constant 52 : index
    %211 = memref.load %arg1[%c52] : memref<95xf32, #tpu.memory_space<smem>>
    %212 = vector.broadcast %211 : f32 to vector<16x128xf32>
    %213 = arith.addf %210, %212 : vector<16x128xf32>
    %cst_31 = arith.constant 2.000000e+01 : f32
    %214 = vector.broadcast %cst_31 : f32 to vector<16x128xf32>
    %215 = arith.minimumf %213, %214 : vector<16x128xf32>
    %cst_32 = arith.constant 2.000000e+01 : f32
    %216 = vector.broadcast %cst_32 : f32 to vector<16x128xf32>
    %217 = arith.cmpf ogt, %213, %216 : vector<16x128xf32>
    %218 = math.exp %215 : vector<16x128xf32>
    %219 = math.log1p %218 : vector<16x128xf32>
    %220 = arith.select %217, %213, %219 : vector<16x128xi1>, vector<16x128xf32>
    %c40 = arith.constant 40 : index
    %221 = memref.load %arg1[%c40] : memref<95xf32, #tpu.memory_space<smem>>
    %222 = vector.broadcast %221 : f32 to vector<16x128xf32>
    %223 = arith.mulf %1, %222 : vector<16x128xf32>
    %c41 = arith.constant 41 : index
    %224 = memref.load %arg1[%c41] : memref<95xf32, #tpu.memory_space<smem>>
    %225 = vector.broadcast %224 : f32 to vector<16x128xf32>
    %226 = arith.mulf %3, %225 : vector<16x128xf32>
    %227 = arith.addf %223, %226 : vector<16x128xf32>
    %c42 = arith.constant 42 : index
    %228 = memref.load %arg1[%c42] : memref<95xf32, #tpu.memory_space<smem>>
    %229 = vector.broadcast %228 : f32 to vector<16x128xf32>
    %230 = arith.mulf %5, %229 : vector<16x128xf32>
    %231 = arith.addf %227, %230 : vector<16x128xf32>
    %c43 = arith.constant 43 : index
    %232 = memref.load %arg1[%c43] : memref<95xf32, #tpu.memory_space<smem>>
    %233 = vector.broadcast %232 : f32 to vector<16x128xf32>
    %234 = arith.mulf %7, %233 : vector<16x128xf32>
    %235 = arith.addf %231, %234 : vector<16x128xf32>
    %c44 = arith.constant 44 : index
    %236 = memref.load %arg1[%c44] : memref<95xf32, #tpu.memory_space<smem>>
    %237 = vector.broadcast %236 : f32 to vector<16x128xf32>
    %238 = arith.mulf %9, %237 : vector<16x128xf32>
    %239 = arith.addf %235, %238 : vector<16x128xf32>
    %c45 = arith.constant 45 : index
    %240 = memref.load %arg1[%c45] : memref<95xf32, #tpu.memory_space<smem>>
    %241 = vector.broadcast %240 : f32 to vector<16x128xf32>
    %242 = arith.mulf %11, %241 : vector<16x128xf32>
    %243 = arith.addf %239, %242 : vector<16x128xf32>
    %c46 = arith.constant 46 : index
    %244 = memref.load %arg1[%c46] : memref<95xf32, #tpu.memory_space<smem>>
    %245 = vector.broadcast %244 : f32 to vector<16x128xf32>
    %246 = arith.mulf %13, %245 : vector<16x128xf32>
    %247 = arith.addf %243, %246 : vector<16x128xf32>
    %c47 = arith.constant 47 : index
    %248 = memref.load %arg1[%c47] : memref<95xf32, #tpu.memory_space<smem>>
    %249 = vector.broadcast %248 : f32 to vector<16x128xf32>
    %250 = arith.mulf %15, %249 : vector<16x128xf32>
    %251 = arith.addf %247, %250 : vector<16x128xf32>
    %c53 = arith.constant 53 : index
    %252 = memref.load %arg1[%c53] : memref<95xf32, #tpu.memory_space<smem>>
    %253 = vector.broadcast %252 : f32 to vector<16x128xf32>
    %254 = arith.addf %251, %253 : vector<16x128xf32>
    %cst_33 = arith.constant 2.000000e+01 : f32
    %255 = vector.broadcast %cst_33 : f32 to vector<16x128xf32>
    %256 = arith.minimumf %254, %255 : vector<16x128xf32>
    %cst_34 = arith.constant 2.000000e+01 : f32
    %257 = vector.broadcast %cst_34 : f32 to vector<16x128xf32>
    %258 = arith.cmpf ogt, %254, %257 : vector<16x128xf32>
    %259 = math.exp %256 : vector<16x128xf32>
    %260 = math.log1p %259 : vector<16x128xf32>
    %261 = arith.select %258, %254, %260 : vector<16x128xi1>, vector<16x128xf32>
    %c54 = arith.constant 54 : index
    %262 = memref.load %arg1[%c54] : memref<95xf32, #tpu.memory_space<smem>>
    %263 = vector.broadcast %262 : f32 to vector<16x128xf32>
    %264 = arith.mulf %56, %263 : vector<16x128xf32>
    %c55 = arith.constant 55 : index
    %265 = memref.load %arg1[%c55] : memref<95xf32, #tpu.memory_space<smem>>
    %266 = vector.broadcast %265 : f32 to vector<16x128xf32>
    %267 = arith.mulf %97, %266 : vector<16x128xf32>
    %268 = arith.addf %264, %267 : vector<16x128xf32>
    %c56 = arith.constant 56 : index
    %269 = memref.load %arg1[%c56] : memref<95xf32, #tpu.memory_space<smem>>
    %270 = vector.broadcast %269 : f32 to vector<16x128xf32>
    %271 = arith.mulf %138, %270 : vector<16x128xf32>
    %272 = arith.addf %268, %271 : vector<16x128xf32>
    %c57 = arith.constant 57 : index
    %273 = memref.load %arg1[%c57] : memref<95xf32, #tpu.memory_space<smem>>
    %274 = vector.broadcast %273 : f32 to vector<16x128xf32>
    %275 = arith.mulf %179, %274 : vector<16x128xf32>
    %276 = arith.addf %272, %275 : vector<16x128xf32>
    %c58 = arith.constant 58 : index
    %277 = memref.load %arg1[%c58] : memref<95xf32, #tpu.memory_space<smem>>
    %278 = vector.broadcast %277 : f32 to vector<16x128xf32>
    %279 = arith.mulf %220, %278 : vector<16x128xf32>
    %280 = arith.addf %276, %279 : vector<16x128xf32>
    %c59 = arith.constant 59 : index
    %281 = memref.load %arg1[%c59] : memref<95xf32, #tpu.memory_space<smem>>
    %282 = vector.broadcast %281 : f32 to vector<16x128xf32>
    %283 = arith.mulf %261, %282 : vector<16x128xf32>
    %284 = arith.addf %280, %283 : vector<16x128xf32>
    %c78 = arith.constant 78 : index
    %285 = memref.load %arg1[%c78] : memref<95xf32, #tpu.memory_space<smem>>
    %286 = vector.broadcast %285 : f32 to vector<16x128xf32>
    %287 = arith.addf %284, %286 : vector<16x128xf32>
    %cst_35 = arith.constant 2.000000e+01 : f32
    %288 = vector.broadcast %cst_35 : f32 to vector<16x128xf32>
    %289 = arith.minimumf %287, %288 : vector<16x128xf32>
    %cst_36 = arith.constant 2.000000e+01 : f32
    %290 = vector.broadcast %cst_36 : f32 to vector<16x128xf32>
    %291 = arith.cmpf ogt, %287, %290 : vector<16x128xf32>
    %292 = math.exp %289 : vector<16x128xf32>
    %293 = math.log1p %292 : vector<16x128xf32>
    %294 = arith.select %291, %287, %293 : vector<16x128xi1>, vector<16x128xf32>
    %c60 = arith.constant 60 : index
    %295 = memref.load %arg1[%c60] : memref<95xf32, #tpu.memory_space<smem>>
    %296 = vector.broadcast %295 : f32 to vector<16x128xf32>
    %297 = arith.mulf %56, %296 : vector<16x128xf32>
    %c61 = arith.constant 61 : index
    %298 = memref.load %arg1[%c61] : memref<95xf32, #tpu.memory_space<smem>>
    %299 = vector.broadcast %298 : f32 to vector<16x128xf32>
    %300 = arith.mulf %97, %299 : vector<16x128xf32>
    %301 = arith.addf %297, %300 : vector<16x128xf32>
    %c62 = arith.constant 62 : index
    %302 = memref.load %arg1[%c62] : memref<95xf32, #tpu.memory_space<smem>>
    %303 = vector.broadcast %302 : f32 to vector<16x128xf32>
    %304 = arith.mulf %138, %303 : vector<16x128xf32>
    %305 = arith.addf %301, %304 : vector<16x128xf32>
    %c63 = arith.constant 63 : index
    %306 = memref.load %arg1[%c63] : memref<95xf32, #tpu.memory_space<smem>>
    %307 = vector.broadcast %306 : f32 to vector<16x128xf32>
    %308 = arith.mulf %179, %307 : vector<16x128xf32>
    %309 = arith.addf %305, %308 : vector<16x128xf32>
    %c64 = arith.constant 64 : index
    %310 = memref.load %arg1[%c64] : memref<95xf32, #tpu.memory_space<smem>>
    %311 = vector.broadcast %310 : f32 to vector<16x128xf32>
    %312 = arith.mulf %220, %311 : vector<16x128xf32>
    %313 = arith.addf %309, %312 : vector<16x128xf32>
    %c65 = arith.constant 65 : index
    %314 = memref.load %arg1[%c65] : memref<95xf32, #tpu.memory_space<smem>>
    %315 = vector.broadcast %314 : f32 to vector<16x128xf32>
    %316 = arith.mulf %261, %315 : vector<16x128xf32>
    %317 = arith.addf %313, %316 : vector<16x128xf32>
    %c79 = arith.constant 79 : index
    %318 = memref.load %arg1[%c79] : memref<95xf32, #tpu.memory_space<smem>>
    %319 = vector.broadcast %318 : f32 to vector<16x128xf32>
    %320 = arith.addf %317, %319 : vector<16x128xf32>
    %cst_37 = arith.constant 2.000000e+01 : f32
    %321 = vector.broadcast %cst_37 : f32 to vector<16x128xf32>
    %322 = arith.minimumf %320, %321 : vector<16x128xf32>
    %cst_38 = arith.constant 2.000000e+01 : f32
    %323 = vector.broadcast %cst_38 : f32 to vector<16x128xf32>
    %324 = arith.cmpf ogt, %320, %323 : vector<16x128xf32>
    %325 = math.exp %322 : vector<16x128xf32>
    %326 = math.log1p %325 : vector<16x128xf32>
    %327 = arith.select %324, %320, %326 : vector<16x128xi1>, vector<16x128xf32>
    %c66 = arith.constant 66 : index
    %328 = memref.load %arg1[%c66] : memref<95xf32, #tpu.memory_space<smem>>
    %329 = vector.broadcast %328 : f32 to vector<16x128xf32>
    %330 = arith.mulf %56, %329 : vector<16x128xf32>
    %c67 = arith.constant 67 : index
    %331 = memref.load %arg1[%c67] : memref<95xf32, #tpu.memory_space<smem>>
    %332 = vector.broadcast %331 : f32 to vector<16x128xf32>
    %333 = arith.mulf %97, %332 : vector<16x128xf32>
    %334 = arith.addf %330, %333 : vector<16x128xf32>
    %c68 = arith.constant 68 : index
    %335 = memref.load %arg1[%c68] : memref<95xf32, #tpu.memory_space<smem>>
    %336 = vector.broadcast %335 : f32 to vector<16x128xf32>
    %337 = arith.mulf %138, %336 : vector<16x128xf32>
    %338 = arith.addf %334, %337 : vector<16x128xf32>
    %c69 = arith.constant 69 : index
    %339 = memref.load %arg1[%c69] : memref<95xf32, #tpu.memory_space<smem>>
    %340 = vector.broadcast %339 : f32 to vector<16x128xf32>
    %341 = arith.mulf %179, %340 : vector<16x128xf32>
    %342 = arith.addf %338, %341 : vector<16x128xf32>
    %c70 = arith.constant 70 : index
    %343 = memref.load %arg1[%c70] : memref<95xf32, #tpu.memory_space<smem>>
    %344 = vector.broadcast %343 : f32 to vector<16x128xf32>
    %345 = arith.mulf %220, %344 : vector<16x128xf32>
    %346 = arith.addf %342, %345 : vector<16x128xf32>
    %c71 = arith.constant 71 : index
    %347 = memref.load %arg1[%c71] : memref<95xf32, #tpu.memory_space<smem>>
    %348 = vector.broadcast %347 : f32 to vector<16x128xf32>
    %349 = arith.mulf %261, %348 : vector<16x128xf32>
    %350 = arith.addf %346, %349 : vector<16x128xf32>
    %c80 = arith.constant 80 : index
    %351 = memref.load %arg1[%c80] : memref<95xf32, #tpu.memory_space<smem>>
    %352 = vector.broadcast %351 : f32 to vector<16x128xf32>
    %353 = arith.addf %350, %352 : vector<16x128xf32>
    %cst_39 = arith.constant 2.000000e+01 : f32
    %354 = vector.broadcast %cst_39 : f32 to vector<16x128xf32>
    %355 = arith.minimumf %353, %354 : vector<16x128xf32>
    %cst_40 = arith.constant 2.000000e+01 : f32
    %356 = vector.broadcast %cst_40 : f32 to vector<16x128xf32>
    %357 = arith.cmpf ogt, %353, %356 : vector<16x128xf32>
    %358 = math.exp %355 : vector<16x128xf32>
    %359 = math.log1p %358 : vector<16x128xf32>
    %360 = arith.select %357, %353, %359 : vector<16x128xi1>, vector<16x128xf32>
    %c72 = arith.constant 72 : index
    %361 = memref.load %arg1[%c72] : memref<95xf32, #tpu.memory_space<smem>>
    %362 = vector.broadcast %361 : f32 to vector<16x128xf32>
    %363 = arith.mulf %56, %362 : vector<16x128xf32>
    %c73 = arith.constant 73 : index
    %364 = memref.load %arg1[%c73] : memref<95xf32, #tpu.memory_space<smem>>
    %365 = vector.broadcast %364 : f32 to vector<16x128xf32>
    %366 = arith.mulf %97, %365 : vector<16x128xf32>
    %367 = arith.addf %363, %366 : vector<16x128xf32>
    %c74 = arith.constant 74 : index
    %368 = memref.load %arg1[%c74] : memref<95xf32, #tpu.memory_space<smem>>
    %369 = vector.broadcast %368 : f32 to vector<16x128xf32>
    %370 = arith.mulf %138, %369 : vector<16x128xf32>
    %371 = arith.addf %367, %370 : vector<16x128xf32>
    %c75 = arith.constant 75 : index
    %372 = memref.load %arg1[%c75] : memref<95xf32, #tpu.memory_space<smem>>
    %373 = vector.broadcast %372 : f32 to vector<16x128xf32>
    %374 = arith.mulf %179, %373 : vector<16x128xf32>
    %375 = arith.addf %371, %374 : vector<16x128xf32>
    %c76 = arith.constant 76 : index
    %376 = memref.load %arg1[%c76] : memref<95xf32, #tpu.memory_space<smem>>
    %377 = vector.broadcast %376 : f32 to vector<16x128xf32>
    %378 = arith.mulf %220, %377 : vector<16x128xf32>
    %379 = arith.addf %375, %378 : vector<16x128xf32>
    %c77 = arith.constant 77 : index
    %380 = memref.load %arg1[%c77] : memref<95xf32, #tpu.memory_space<smem>>
    %381 = vector.broadcast %380 : f32 to vector<16x128xf32>
    %382 = arith.mulf %261, %381 : vector<16x128xf32>
    %383 = arith.addf %379, %382 : vector<16x128xf32>
    %c81 = arith.constant 81 : index
    %384 = memref.load %arg1[%c81] : memref<95xf32, #tpu.memory_space<smem>>
    %385 = vector.broadcast %384 : f32 to vector<16x128xf32>
    %386 = arith.addf %383, %385 : vector<16x128xf32>
    %cst_41 = arith.constant 2.000000e+01 : f32
    %387 = vector.broadcast %cst_41 : f32 to vector<16x128xf32>
    %388 = arith.minimumf %386, %387 : vector<16x128xf32>
    %cst_42 = arith.constant 2.000000e+01 : f32
    %389 = vector.broadcast %cst_42 : f32 to vector<16x128xf32>
    %390 = arith.cmpf ogt, %386, %389 : vector<16x128xf32>
    %391 = math.exp %388 : vector<16x128xf32>
    %392 = math.log1p %391 : vector<16x128xf32>
    %393 = arith.select %390, %386, %392 : vector<16x128xi1>, vector<16x128xf32>
    %c82 = arith.constant 82 : index
    %394 = memref.load %arg1[%c82] : memref<95xf32, #tpu.memory_space<smem>>
    %395 = vector.broadcast %394 : f32 to vector<16x128xf32>
    %396 = arith.mulf %294, %395 : vector<16x128xf32>
    %c83 = arith.constant 83 : index
    %397 = memref.load %arg1[%c83] : memref<95xf32, #tpu.memory_space<smem>>
    %398 = vector.broadcast %397 : f32 to vector<16x128xf32>
    %399 = arith.mulf %327, %398 : vector<16x128xf32>
    %400 = arith.addf %396, %399 : vector<16x128xf32>
    %c84 = arith.constant 84 : index
    %401 = memref.load %arg1[%c84] : memref<95xf32, #tpu.memory_space<smem>>
    %402 = vector.broadcast %401 : f32 to vector<16x128xf32>
    %403 = arith.mulf %360, %402 : vector<16x128xf32>
    %404 = arith.addf %400, %403 : vector<16x128xf32>
    %c85 = arith.constant 85 : index
    %405 = memref.load %arg1[%c85] : memref<95xf32, #tpu.memory_space<smem>>
    %406 = vector.broadcast %405 : f32 to vector<16x128xf32>
    %407 = arith.mulf %393, %406 : vector<16x128xf32>
    %408 = arith.addf %404, %407 : vector<16x128xf32>
    %c90 = arith.constant 90 : index
    %409 = memref.load %arg1[%c90] : memref<95xf32, #tpu.memory_space<smem>>
    %410 = vector.broadcast %409 : f32 to vector<16x128xf32>
    %411 = arith.addf %408, %410 : vector<16x128xf32>
    %cst_43 = arith.constant 2.000000e+01 : f32
    %412 = vector.broadcast %cst_43 : f32 to vector<16x128xf32>
    %413 = arith.minimumf %411, %412 : vector<16x128xf32>
    %cst_44 = arith.constant 2.000000e+01 : f32
    %414 = vector.broadcast %cst_44 : f32 to vector<16x128xf32>
    %415 = arith.cmpf ogt, %411, %414 : vector<16x128xf32>
    %416 = math.exp %413 : vector<16x128xf32>
    %417 = math.log1p %416 : vector<16x128xf32>
    %418 = arith.select %415, %411, %417 : vector<16x128xi1>, vector<16x128xf32>
    %c86 = arith.constant 86 : index
    %419 = memref.load %arg1[%c86] : memref<95xf32, #tpu.memory_space<smem>>
    %420 = vector.broadcast %419 : f32 to vector<16x128xf32>
    %421 = arith.mulf %294, %420 : vector<16x128xf32>
    %c87 = arith.constant 87 : index
    %422 = memref.load %arg1[%c87] : memref<95xf32, #tpu.memory_space<smem>>
    %423 = vector.broadcast %422 : f32 to vector<16x128xf32>
    %424 = arith.mulf %327, %423 : vector<16x128xf32>
    %425 = arith.addf %421, %424 : vector<16x128xf32>
    %c88 = arith.constant 88 : index
    %426 = memref.load %arg1[%c88] : memref<95xf32, #tpu.memory_space<smem>>
    %427 = vector.broadcast %426 : f32 to vector<16x128xf32>
    %428 = arith.mulf %360, %427 : vector<16x128xf32>
    %429 = arith.addf %425, %428 : vector<16x128xf32>
    %c89 = arith.constant 89 : index
    %430 = memref.load %arg1[%c89] : memref<95xf32, #tpu.memory_space<smem>>
    %431 = vector.broadcast %430 : f32 to vector<16x128xf32>
    %432 = arith.mulf %393, %431 : vector<16x128xf32>
    %433 = arith.addf %429, %432 : vector<16x128xf32>
    %c91 = arith.constant 91 : index
    %434 = memref.load %arg1[%c91] : memref<95xf32, #tpu.memory_space<smem>>
    %435 = vector.broadcast %434 : f32 to vector<16x128xf32>
    %436 = arith.addf %433, %435 : vector<16x128xf32>
    %cst_45 = arith.constant 2.000000e+01 : f32
    %437 = vector.broadcast %cst_45 : f32 to vector<16x128xf32>
    %438 = arith.minimumf %436, %437 : vector<16x128xf32>
    %cst_46 = arith.constant 2.000000e+01 : f32
    %439 = vector.broadcast %cst_46 : f32 to vector<16x128xf32>
    %440 = arith.cmpf ogt, %436, %439 : vector<16x128xf32>
    %441 = math.exp %438 : vector<16x128xf32>
    %442 = math.log1p %441 : vector<16x128xf32>
    %443 = arith.select %440, %436, %442 : vector<16x128xi1>, vector<16x128xf32>
    %c92 = arith.constant 92 : index
    %444 = memref.load %arg1[%c92] : memref<95xf32, #tpu.memory_space<smem>>
    %445 = vector.broadcast %444 : f32 to vector<16x128xf32>
    %446 = arith.mulf %418, %445 : vector<16x128xf32>
    %c93 = arith.constant 93 : index
    %447 = memref.load %arg1[%c93] : memref<95xf32, #tpu.memory_space<smem>>
    %448 = vector.broadcast %447 : f32 to vector<16x128xf32>
    %449 = arith.mulf %443, %448 : vector<16x128xf32>
    %450 = arith.addf %446, %449 : vector<16x128xf32>
    %c94 = arith.constant 94 : index
    %451 = memref.load %arg1[%c94] : memref<95xf32, #tpu.memory_space<smem>>
    %452 = vector.broadcast %451 : f32 to vector<16x128xf32>
    %453 = arith.addf %450, %452 : vector<16x128xf32>
    %cst_47 = arith.constant 0.000000e+00 : f32
    %454 = vector.broadcast %cst_47 : f32 to vector<16x128xf32>
    %455 = arith.subf %454, %453 : vector<16x128xf32>
    %456 = math.exp %455 : vector<16x128xf32>
    %cst_48 = arith.constant 1.000000e+00 : f32
    %457 = vector.broadcast %cst_48 : f32 to vector<16x128xf32>
    %458 = arith.addf %457, %456 : vector<16x128xf32>
    %cst_49 = arith.constant 1.000000e+00 : f32
    %459 = vector.broadcast %cst_49 : f32 to vector<16x128xf32>
    %460 = arith.divf %459, %458 : vector<16x128xf32>
    %c0_50 = arith.constant 0 : index
    %c0_51 = arith.constant 0 : index
    %461 = vector.load %arg3[%c0_50, %c0_51] : memref<16x128xf32, #tpu.memory_space<vmem>>, vector<16x128xf32>
    tpu.vector_store %arg3[%c0_50, %c0_51], %460 {strides = array<i32>} : memref<16x128xf32, #tpu.memory_space<vmem>>, vector<16x128xf32>,
    return
  }
  func.func @transform_0(%arg0: i32) -> i32 {
    %c0_i32 = arith.constant 0 : i32
    %c0_i32_0 = arith.constant 0 : i32
    return %c0_i32 : i32
  }
  func.func @transform_1(%arg0: i32) -> (i32, i32, i32) {
    %c0_i32 = arith.constant 0 : i32
    %c0_i32_0 = arith.constant 0 : i32
    %c0_i32_1 = arith.constant 0 : i32
    return %c0_i32, %arg0, %c0_i32_0 : i32, i32, i32
  }
  func.func @transform_2(%arg0: i32) -> (i32, i32) {
    %c0_i32 = arith.constant 0 : i32
    %c0_i32_0 = arith.constant 0 : i32
    return %arg0, %c0_i32 : i32, i32
  }
}

</mosaic_0001>

<bundles_post_ra>
// kernel: diabetes_model_forward.1
= control target key start
LH: loop header
LB: loop body
LE: loop exit
PB: predicated region body
PF: predicated region fallthrough
CT: control target
= control target key end

     0   :  { %7 = vsyncpa [#allocation3], 0  ;;  %s1543_s9 = smov 0   ;;  %s1545_s10 = smov 0   ;;  %s2579_s0 = inlined_call_operand.vmem [shape: f32[95], index: 0, kind: input, shape index: {}]   ;;  %s2580_s1 = inlined_call_operand.vmem [shape: f32[8,48,128], index: 1, kind: input, shape index: {}]   ;;  %s2581_s2 = inlined_call_operand.vmem [shape: f32[48,128], index: 2, kind: output, shape index: {}]  }
   0x1   :  { %s1547_s11 = smov 0  }
   0x2 LB: > { %s1221_s12 = sadd.s32 4294967295, %s1525_s11   ;;  %s1560_s13 = sadd.s32 1, %s1525_s11   ;;  %s1525_s11 = sphi %s1547_s11, %s2633_s11   ;;  %s1521_s10 = sphi %s1545_s10, %s2632_s10   ;;  %s1517_s9 = sphi %s1543_s9, %s2631_s9  }
   0x3   : > { %s38_s14 = ssub.s32 %s1525_s11, %s1560_s13  ;;  %s41_s15 = sadd.s32 1, %s1521_s10 }
   0x4   : > { %p39_p0 = scmp.eq.s32.totalorder %s38_s14, 0  ;;  %p48_p1 = scmp.ne.s32.totalorder %s1521_s10, %s1517_s9 }
   0x5   : > { %p49_p2 = scmp.eq.s32.totalorder %s1525_s11, 0  ;;  %p1223_p3 = scmp.ge.s32.totalorder %s1525_s11, 1 }
   0x6   : > { %s1570_s16 = scalar_select %p39_p0, %s1521_s10, %s41_s15  }
   0x7   : > { %p1572_p4 = por %p49_p2, %p48_p1  ;;  %p91_p5 = scmp.lt.s32.totalorder %s1525_s11, 4 }
   0x8   : > { %p1579_p6 = scmp.eq.s32.totalorder %s1221_s12, 0  ;;  %s104_s22 = sshll.u32 %s2579_s0, 4  ;;  %s105_s22 = int_to_ptr.vmem [resolvable:$true] %s104_s22 }
   0x9   : > { %p1583_p7 = pnand %p1223_p3, %p91_p5  ;;  %s1484_s23 = scalar_lea.vmem %s105_s22, 16 }
   0xa   : > { %p1485_p10 = scmp.ne.s32.totalorder %s105_s22, %s1484_s23  ;;  %p1492_p0 = scmp.lt.s32.totalorder %s105_s22, %s105_s22 }
   0xb   : > { %p1349_p8 = pneg %p1583_p7  ;;  %p1493_p1 = scmp.lt.s32.totalorder %s1484_s23, %s1484_s23 }
   0xd   : > { %p1350_p9 = pnand %p1579_p6, %p1349_p8  ;;  %p1494_p2 = por %p1493_p1, %p1492_p0 }
   0xf   : > { %p1486_p11 = pneg %p1350_p9 }
  0x11   : > { %p1487_p12 = pnand %p1486_p11, %p1485_p10 }
  0x13   : > { %p1488_p13 = pneg %p1487_p12 }
  0x15   : > { %p1495_p3 = pnand %p1494_p2, %p1488_p13 }
  0x17   : > { %1498 = shalt.err (!%p1495_p3)
}
  0x18   : > { %s1527_s24 = smov [#allocation2]   ;;  %p1225_p5 = scmp.ge.s32.totalorder %s1525_s11, 3 }
  0x19   : > { %1352 = dma.vmem_to_smem (!%p1350_p9), %s105_s22, 16, %s1527_s24, [#allocation3]  }
  0x1a   : > { %111 = sbr.rel (%p1225_p5) target bundleno = 43 (0x2b), region = 20 }
  0x1f   : > { %114 = sbr.rel (!%p1572_p4) target bundleno = 43 (0x2b), region = 24  ;;  %s116_s25 = sand.u32 (%p1572_p4), 1, %s1521_s10  }
  0x20   : > { %s1344_s26 = sshll.u32 (%p1572_p4), %s1525_s11, 4  ;;  %s1226_s27 = sshll.u32 (%p1572_p4), %s116_s25, 7 }
  0x21   : > { %s1602_s30 = scalar_lea.vmem (%p1572_p4), %s2580_s1, %s1344_s26  ;;  %s118_s3 = scalar_lea.vmem (%p1572_p4), [#allocation4], %s1226_s27 }
  0x22   : > { %v180_v0 = vld [vmem:[%s1602_s30] sm:$0xff] (%p1572_p4)  ;;  %v182_v1 = vld [vmem:[%s1602_s30 + $0x8] sm:$0xff] (%p1572_p4)  ;;  %v184_v2 = vld [vmem:[%s1602_s30 + $0x30] sm:$0xff] (%p1572_p4) }
  0x23   : > { %181 = vst [vmem:[%s118_s3] sm:$0xff] (%p1572_p4), %v180_v0  ;;  %183 = vst [vmem:[%s118_s3 + $0x8] sm:$0xff] (%p1572_p4), %v182_v1  ;;  %v186_v3 = vld [vmem:[%s1602_s30 + $0x38] sm:$0xff] (%p1572_p4)  ;;  %v188_v4 = vld [vmem:[%s1602_s30 + $0x60] sm:$0xff] (%p1572_p4) }
  0x24   : > { %185 = vst [vmem:[%s118_s3 + $0x10] sm:$0xff] %v184_v2  ;;  %v190_v5 = vld [vmem:[%s1602_s30 + $0x68] sm:$0xff]  ;;  %187 = vst [vmem:[%s118_s3 + $0x18] sm:$0xff] %v186_v3  ;;  %v192_v6 = vld [vmem:[%s1602_s30 + $0x90] sm:$0xff] }
  0x25   : > { %189 = vst [vmem:[%s118_s3 + $0x20] sm:$0xff] %v188_v4  ;;  %191 = vst [vmem:[%s118_s3 + $0x28] sm:$0xff] %v190_v5  ;;  %v194_v7 = vld [vmem:[%s1602_s30 + $0x98] sm:$0xff]  ;;  %v196_v8 = vld [vmem:[%s1602_s30 + $0xc0] sm:$0xff] }
  0x26   : > { %193 = vst [vmem:[%s118_s3 + $0x30] sm:$0xff] %v192_v6  ;;  %195 = vst [vmem:[%s118_s3 + $0x38] sm:$0xff] %v194_v7  ;;  %v198_v9 = vld [vmem:[%s1602_s30 + $0xc8] sm:$0xff]  ;;  %v200_v10 = vld [vmem:[%s1602_s30 + $0xf0] sm:$0xff] }
  0x27   : > { %197 = vst [vmem:[%s118_s3 + $0x40] sm:$0xff] %v196_v8  ;;  %v202_v11 = vld [vmem:[%s1602_s30 + $0xf8] sm:$0xff]  ;;  %199 = vst [vmem:[%s118_s3 + $0x48] sm:$0xff] %v198_v9  ;;  %v204_v12 = vld [vmem:[%s1602_s30 + $0x120] sm:$0xff] }
  0x28   : > { %201 = vst [vmem:[%s118_s3 + $0x50] sm:$0xff] %v200_v10  ;;  %203 = vst [vmem:[%s118_s3 + $0x58] sm:$0xff] %v202_v11  ;;  %v206_v13 = vld [vmem:[%s1602_s30 + $0x128] sm:$0xff]  ;;  %v208_v14 = vld [vmem:[%s1602_s30 + $0x150] sm:$0xff] }
  0x29   : > { %205 = vst [vmem:[%s118_s3 + $0x60] sm:$0xff] %v204_v12  ;;  %207 = vst [vmem:[%s118_s3 + $0x68] sm:$0xff] %v206_v13  ;;  %v210_v15 = vld [vmem:[%s1602_s30 + $0x158] sm:$0xff] }
  0x2a   : > { %209 = vst [vmem:[%s118_s3 + $0x70] sm:$0xff] %v208_v14  ;;  %211 = vst [vmem:[%s118_s3 + $0x78] sm:$0xff] %v210_v15 }
  0x2b PF: > { %220 = sbr.rel (%p1583_p7) target bundleno = 329 (0x149), region = 62 }
  0x30   : > { %1512 = dma.done.wait (%p1579_p6), [#allocation3], 16  }
  0x31   : > { %1514 = vsyncadd (%p1579_p6), [#allocation3], 4294967280  ;;  %s227_s4 = sand.u32 1, %s1517_s9  }
  0x32   : > { %s1231_s5 = sshll.u32 %s227_s4, 7 }
  0x33   : > { %s1627_s6 = scalar_lea.vmem [#allocation4], %s1231_s5 }
  0x34   : > { %233 = sfence }
  0x35   : > { %s279_s7 = sld [smem:[#allocation2]]  ;;  %v1630_v16 = vld [vmem:[%s1627_s6] sm:$0xff]  ;;  %v1633_v17 = vld [vmem:[%s1627_s6 + $0x8] sm:$0xff]  ;;  %v1636_v18 = vld [vmem:[%s1627_s6 + $0x10] sm:$0xff] }
  0x36   : > { %s1248_s8 = sld [smem:[#allocation2 + $0x1]]  ;;  %v1639_v19 = vld [vmem:[%s1627_s6 + $0x18] sm:$0xff]  ;;  %v1644_v20 = vld [vmem:[%s1627_s6 + $0x20] sm:$0xff]  ;;  %v1647_v21 = vld [vmem:[%s1627_s6 + $0x28] sm:$0xff] }
  0x37   : > { %s1249_s14 = sld [smem:[#allocation2 + $0x2]]  ;;  %v1656_v26 = vld [vmem:[%s1627_s6 + $0x30] sm:$0xff]  ;;  %v1659_v27 = vld [vmem:[%s1627_s6 + $0x38] sm:$0xff]  ;;  %v1666_v31 = vld [vmem:[%s1627_s6 + $0x40] sm:$0xff] }
  0x38   : > { %s1250_s9 = sld [smem:[#allocation2 + $0x3]]  ;;  %v1669_v32 = vld [vmem:[%s1627_s6 + $0x48] sm:$0xff]  ;;  %v1678_v38 = vld [vmem:[%s1627_s6 + $0x50] sm:$0xff]  ;;  %v1681_v39 = vld [vmem:[%s1627_s6 + $0x58] sm:$0xff] }
  0x39   : > { %s1641_s15 = sld [smem:[#allocation2 + $0x4]]  ;;  %v1689_v43 = vld [vmem:[%s1627_s6 + $0x60] sm:$0xff]  ;;  %v1696_v48 = vld [vmem:[%s1627_s6 + $0x68] sm:$0xff]  ;;  %v1703_v51 = vld [vmem:[%s1627_s6 + $0x70] sm:$0xff] }
  0x3a   : > { %s1649_s17 = sld [smem:[#allocation2 + $0x5]]  ;;  %v1706_v52 = vld [vmem:[%s1627_s6 + $0x78] sm:$0xff] }
  0x3b   : > { %v280_v22 = vstv %s279_s7  ;;  %s1653_s18 = sld [smem:[#allocation2 + $0x6]] }
  0x3c   : > { %v281_v23 = vmul.f32 %v280_v22, %v1630_v16  ;;  %v282_v24 = vmul.f32 %v280_v22, %v1633_v17  ;;  %v284_v25 = vstv %s1248_s8  ;;  %s1663_s19 = sld [smem:[#allocation2 + $0x7]] }
  0x3d   : > { %v285_v28 = vmul.f32 %v1636_v18, %v284_v25  ;;  %v286_v29 = vmul.f32 %v1639_v19, %v284_v25  ;;  %v290_v30 = vstv %s1249_s14  ;;  %s1673_s20 = sld [smem:[#allocation2 + $0x30]] }
  0x3e   : > { %v291_v33 = vmul.f32 %v1644_v20, %v290_v30  ;;  %v292_v34 = vmul.f32 %v1647_v21, %v290_v30  ;;  %v296_v37 = vstv %s1250_s9  ;;  %s1675_s21 = sld [smem:[#allocation2 + $0x8]] }
  0x3f   : > { %v287_v35 = vadd.f32 %v285_v28, %v281_v23  ;;  %v288_v36 = vadd.f32 %v286_v29, %v282_v24  ;;  %v297_v40 = vmul.f32 %v1656_v26, %v296_v37  ;;  %v298_v41 = vmul.f32 %v1659_v27, %v296_v37  ;;  %s1686_s22 = sld [smem:[#allocation2 + $0x9]] }
  0x40   : > { %v302_v42 = vstv %s1641_s15  ;;  %s1693_s23 = sld [smem:[#allocation2 + $0xa]]  ;;  %v308_v49 = vstv %s1649_s17 }
  0x41   : > { %v293_v44 = vadd.f32 %v291_v33, %v287_v35  ;;  %v294_v45 = vadd.f32 %v292_v34, %v288_v36  ;;  %v303_v46 = vmul.f32 %v1666_v31, %v302_v42  ;;  %v304_v47 = vmul.f32 %v1669_v32, %v302_v42  ;;  %s1700_s24 = sld [smem:[#allocation2 + $0xb]] }
  0x42   : > { %v314_v50 = vstv %s1653_s18  ;;  %v309_v55 = vmul.f32 %v1678_v38, %v308_v49  ;;  %v310_v56 = vmul.f32 %v1681_v39, %v308_v49  ;;  %s1710_s25 = sld [smem:[#allocation2 + $0xc]]  ;;  %v320_v58 = vstv %s1663_s19 }
  0x43   : > { %v299_v53 = vadd.f32 %v297_v40, %v293_v44  ;;  %v300_v54 = vadd.f32 %v298_v41, %v294_v45  ;;  %v315_v57 = vmul.f32 %v1689_v43, %v314_v50  ;;  %s1714_s26 = sld [smem:[#allocation2 + $0xd]]  ;;  %v316_v61 = vmul.f32 %v1696_v48, %v314_v50 }
  0x44   : > { %v326_v62 = vstv %s1673_s20  ;;  %v321_v63 = vmul.f32 %v1703_v51, %v320_v58  ;;  %v322_v0 = vmul.f32 %v1706_v52, %v320_v58  ;;  %v358_v1 = vstv %s1675_s21  ;;  %s1722_s27 = sld [smem:[#allocation2 + $0xe]] }
  0x45   : > { %v305_v59 = vadd.f32 %v303_v46, %v299_v53  ;;  %v306_v60 = vadd.f32 %v304_v47, %v300_v54  ;;  %v362_v2 = vstv %s1686_s22  ;;  %v359_v5 = vmul.f32 %v358_v1, %v1630_v16  ;;  %s1726_s28 = sld [smem:[#allocation2 + $0xf]] }
  0x46   : > { %v360_v6 = vmul.f32 %v358_v1, %v1633_v17  ;;  %v363_v7 = vmul.f32 %v1636_v18, %v362_v2  ;;  %v364_v8 = vmul.f32 %v1639_v19, %v362_v2  ;;  %v368_v9 = vstv %s1693_s23  ;;  %s1736_s29 = sld [smem:[#allocation2 + $0x10]] }
  0x47   : > { %v311_v3 = vadd.f32 %v309_v55, %v305_v59  ;;  %v312_v4 = vadd.f32 %v310_v56, %v306_v60  ;;  %v374_v10 = vstv %s1700_s24  ;;  %v369_v13 = vmul.f32 %v1644_v20, %v368_v9  ;;  %s1740_s30 = sld [smem:[#allocation2 + $0x11]] }
  0x48   : > { %v370_v14 = vmul.f32 %v1647_v21, %v368_v9  ;;  %v365_v15 = vadd.f32 %v363_v7, %v359_v5  ;;  %v366_v22 = vadd.f32 %v364_v8, %v360_v6  ;;  %v375_v23 = vmul.f32 %v1656_v26, %v374_v10  ;;  %s1744_s3 = sld [smem:[#allocation2 + $0x12]] }
  0x49   : > { %v317_v11 = vadd.f32 %v315_v57, %v311_v3  ;;  %v318_v12 = vadd.f32 %v316_v61, %v312_v4  ;;  %v376_v24 = vmul.f32 %v1659_v27, %v374_v10  ;;  %v380_v28 = vstv %s1710_s25  ;;  %s1749_s4 = sld [smem:[#allocation2 + $0x13]] }
  0x4a   : > { %v386_v29 = vstv %s1714_s26  ;;  %v371_v30 = vadd.f32 %v369_v13, %v365_v15  ;;  %v372_v33 = vadd.f32 %v370_v14, %v366_v22  ;;  %v381_v34 = vmul.f32 %v1666_v31, %v380_v28  ;;  %s1753_s5 = sld [smem:[#allocation2 + $0x14]] }
  0x4b   : > { %v323_v25 = vadd.f32 %v321_v63, %v317_v11  ;;  %v382_v35 = vmul.f32 %v1669_v32, %v380_v28  ;;  %v324_v36 = vadd.f32 %v322_v0, %v318_v12  ;;  %v387_v40 = vmul.f32 %v1678_v38, %v386_v29  ;;  %s1758_s6 = sld [smem:[#allocation2 + $0x31]] }
  0x4c   : > { %v377_v41 = vadd.f32 %v375_v23, %v371_v30  ;;  %v378_v42 = vadd.f32 %v376_v24, %v372_v33  ;;  %v388_v44 = vmul.f32 %v1681_v39, %v386_v29  ;;  %v392_v45 = vstv %s1722_s27  ;;  %s1762_s7 = sld [smem:[#allocation2 + $0x15]] }
  0x4d   : > { %v1746_v37 = vadd.f32 %v326_v62, %v323_v25  ;;  %v398_v46 = vstv %s1726_s28  ;;  %v393_v50 = vmul.f32 %v1689_v43, %v392_v45  ;;  %v394_v53 = vmul.f32 %v1696_v48, %v392_v45  ;;  %s1766_s8 = sld [smem:[#allocation2 + $0x16]] }
  0x4e   : > { %v383_v47 = vadd.f32 %v381_v34, %v377_v41  ;;  %v384_v49 = vadd.f32 %v382_v35, %v378_v42  ;;  %v1760_v54 = vadd.f32 %v326_v62, %v324_v36  ;;  %v436_v58 = vstv %s1736_s29  ;;  %s1778_s14 = sld [smem:[#allocation2 + $0x17]] }
  0x4f   : > { %v329_v55 = vmin.f32 %v1746_v37, 20.0  ;;  %v399_v59 = vmul.f32 %v1703_v51, %v398_v46  ;;  %v437_v60 = vmul.f32 %v436_v58, %v1630_v16  ;;  %v438_v61 = vmul.f32 %v436_v58, %v1633_v17  ;;  %s1786_s9 = sld [smem:[#allocation2 + $0x18]] }
  0x50   : > { %v389_v56 = vadd.f32 %v387_v40, %v383_v47  ;;  %v390_v57 = vadd.f32 %v388_v44, %v384_v49  ;;  %v440_v62 = vstv %s1740_s30  ;;  %v400_v1 = vmul.f32 %v1706_v52, %v398_v46  ;;  %s1791_s15 = sld [smem:[#allocation2 + $0x32]] }
  0x51   : > { %v441_v2 = vmul.f32 %v1636_v18, %v440_v62  ;;  %v330_v3 = vmin.f32 %v1760_v54, 20.0  ;;  %v442_v4 = vmul.f32 %v1639_v19, %v440_v62  ;;  %v446_v5 = vstv %s1744_s3  ;;  %s1794_s17 = sld [smem:[#allocation2 + $0x19]] }
  0x52   : > { %v395_v63 = vadd.f32 %v393_v50, %v389_v56  ;;  %v396_v0 = vadd.f32 %v394_v53, %v390_v57  ;;  %v452_v6 = vstv %s1749_s4  ;;  %v333_v7 = vmul.f32 1.442695, %v329_v55  ;;  %s1798_s18 = sld [smem:[#allocation2 + $0x1a]] }
  0x53   : > { %v443_v8 = vadd.f32 %v441_v2, %v437_v60  ;;  %v447_v9 = vmul.f32 %v1644_v20, %v446_v5  ;;  %v458_v10 = vstv %s1753_s5  ;;  %v444_v11 = vadd.f32 %v442_v4, %v438_v61  ;;  %s1806_s19 = sld [smem:[#allocation2 + $0x1b]] }
  0x54   : > { %v448_v12 = vmul.f32 %v1647_v21, %v446_v5  ;;  %v453_v13 = vmul.f32 %v1656_v26, %v452_v6  ;;  %v454_v14 = vmul.f32 %v1659_v27, %v452_v6  ;;  %v401_v15 = vadd.f32 %v399_v59, %v395_v63  ;;  %s1814_s20 = sld [smem:[#allocation2 + $0x1c]] }
  0x55   : > { %v402_v22 = vadd.f32 %v400_v1, %v396_v0  ;;  %v404_v23 = vstv %s1758_s6  ;;  %v449_v24 = vadd.f32 %v447_v9, %v443_v8  ;;  %v459_v28 = vmul.f32 %v1666_v31, %v458_v10  ;;  %s1818_s21 = sld [smem:[#allocation2 + $0x1d]] }
  0x56   : > { %v450_v25 = vadd.f32 %v448_v12, %v444_v11  ;;  %v460_v29 = vmul.f32 %v1669_v32, %v458_v10  ;;  %v464_v30 = vstv %s1762_s7  ;;  %v470_v33 = vstv %s1766_s8  ;;  %s1832_s22 = sld [smem:[#allocation2 + $0x1e]] }
  0x57   : > { %v455_v34 = vadd.f32 %v453_v13, %v449_v24  ;;  %v465_v36 = vmul.f32 %v1678_v38, %v464_v30  ;;  %v466_v40 = vmul.f32 %v1681_v39, %v464_v30  ;;  %1380 = vpow2.f32 %v333_v7  ;;  %s1836_s23 = sld [smem:[#allocation2 + $0x1f]] }
  0x58   : > { %v456_v35 = vadd.f32 %v454_v14, %v450_v25  ;;  %v335_v41 = vmul.f32 1.442695, %v330_v3  ;;  %v1800_v42 = vadd.f32 %v404_v23, %v401_v15  ;;  %v1802_v44 = vadd.f32 %v404_v23, %v402_v22  ;;  %s1846_s24 = sld [smem:[#allocation2 + $0x20]] }
  0x59   : > { %v461_v45 = vadd.f32 %v459_v28, %v455_v34  ;;  %v471_v47 = vmul.f32 %v1689_v43, %v470_v33  ;;  %v476_v49 = vstv %s1778_s14  ;;  %v472_v50 = vmul.f32 %v1696_v48, %v470_v33  ;;  %s1850_s25 = sld [smem:[#allocation2 + $0x33]] }
  0x5a   : > { %v462_v46 = vadd.f32 %v460_v29, %v456_v35  ;;  %v477_v56 = vmul.f32 %v1703_v51, %v476_v49  ;;  %v407_v57 = vmin.f32 %v1800_v42, 20.0  ;;  %v478_v58 = vmul.f32 %v1706_v52, %v476_v49  ;;  %s1852_s26 = sld [smem:[#allocation2 + $0x21]] }
  0x5b   : > { %v467_v53 = vadd.f32 %v465_v36, %v461_v45  ;;  %v514_v59 = vstv %s1786_s9  ;;  %1382 = vpow2.f32 %v335_v41  ;;  %v408_v60 = vmin.f32 %v1802_v44, 20.0  ;;  %s1857_s27 = sld [smem:[#allocation2 + $0x22]] }
  0x5c   : > { %v468_v55 = vadd.f32 %v466_v40, %v462_v46  ;;  %v482_v63 = vstv %s1791_s15  ;;  %v518_v0 = vstv %s1794_s17  ;;  %v515_v2 = vmul.f32 %v514_v59, %v1630_v16  ;;  %s1863_s28 = sld [smem:[#allocation2 + $0x23]] }
  0x5d   : > { %v473_v61 = vadd.f32 %v471_v47, %v467_v53  ;;  %v516_v3 = vmul.f32 %v514_v59, %v1633_v17  ;;  %v524_v4 = vstv %s1798_s18  ;;  %v411_v5 = vmul.f32 1.442695, %v407_v57  ;;  %s1879_s29 = sld [smem:[#allocation2 + $0x24]] }
  0x5e   : > { %v474_v62 = vadd.f32 %v472_v50, %v468_v55  ;;  %v413_v7 = vmul.f32 1.442695, %v408_v60  ;;  %v519_v8 = vmul.f32 %v1636_v18, %v518_v0  ;;  %v520_v9 = vmul.f32 %v1639_v19, %v518_v0  ;;  %s1886_s30 = sld [smem:[#allocation2 + $0x25]] }
  0x5f   : > { %v479_v1 = vadd.f32 %v477_v56, %v473_v61  ;;  %v530_v10 = vstv %s1806_s19  ;;  %v525_v12 = vmul.f32 %v1644_v20, %v524_v4  ;;  %v526_v13 = vmul.f32 %v1647_v21, %v524_v4  ;;  %s1891_s3 = sld [smem:[#allocation2 + $0x26]] }
  0x60   : > { %v480_v6 = vadd.f32 %v478_v58, %v474_v62  ;;  %v521_v15 = vadd.f32 %v519_v8, %v515_v2  ;;  %v522_v22 = vadd.f32 %v520_v9, %v516_v3  ;;  %1384 = vpow2.f32 %v411_v5  ;;  %s1896_s4 = sld [smem:[#allocation2 + $0x27]] }
  0x61   : > { %v1826_v11 = vadd.f32 %v482_v63, %v479_v1  ;;  %v531_v23 = vmul.f32 %v1656_v26, %v530_v10  ;;  %v532_v24 = vmul.f32 %v1659_v27, %v530_v10  ;;  %1386 = vpow2.f32 %v413_v7  ;;  %s1904_s5 = sld [smem:[#allocation2 + $0x28]] }
  0x62   : > { %v1830_v14 = vadd.f32 %v482_v63, %v480_v6  ;;  %v527_v28 = vadd.f32 %v525_v12, %v521_v15  ;;  %v528_v29 = vadd.f32 %v526_v13, %v522_v22  ;;  %v536_v30 = vstv %s1814_s20  ;;  %s1908_s6 = sld [smem:[#allocation2 + $0x29]] }
  0x63   : > { %v485_v33 = vmin.f32 %v1826_v11, 20.0  ;;  %v537_v34 = vmul.f32 %v1666_v31, %v536_v30  ;;  %v538_v35 = vmul.f32 %v1669_v32, %v536_v30  ;;  %v542_v36 = vstv %s1818_s21  ;;  %s1920_s7 = sld [smem:[#allocation2 + $0x2a]] }
  0x64   : > { %v1838_v25 = vpop.eup %1380  ;;  %v486_v40 = vmin.f32 %v1830_v14, 20.0  ;;  %v533_v41 = vadd.f32 %v531_v23, %v527_v28  ;;  %v534_v45 = vadd.f32 %v532_v24, %v528_v29  ;;  %v543_v47 = vmul.f32 %v1678_v38, %v542_v36  ;;  %s1932_s8 = sld [smem:[#allocation2 + $0x34]] }
  0x65   : > { %v337_v46 = vadd.f32 1.0, %v1838_v25  ;;  %v489_v53 = vmul.f32 1.442695, %v485_v33  ;;  %v544_v57 = vmul.f32 %v1681_v39, %v542_v36  ;;  %v548_v59 = vstv %s1832_s22  ;;  %s1939_s14 = sld [smem:[#allocation2 + $0x2b]] }
  0x66   : > { %v539_v49 = vadd.f32 %v537_v34, %v533_v41  ;;  %v540_v55 = vadd.f32 %v538_v35, %v534_v45  ;;  %v491_v56 = vmul.f32 1.442695, %v486_v40  ;;  %v554_v60 = vstv %s1836_s23  ;;  %s1955_s9 = sld [smem:[#allocation2 + $0x2c]] }
  0x67   : > { %1388 = vlog2.f32 %v337_v46  ;;  %v549_v63 = vmul.f32 %v1689_v43, %v548_v59  ;;  %v550_v0 = vmul.f32 %v1696_v48, %v548_v59  ;;  %v555_v1 = vmul.f32 %v1703_v51, %v554_v60  ;;  %s1968_s15 = sld [smem:[#allocation2 + $0x2d]] }
  0x68   : > { %v1854_v50 = vpop.eup %1382  ;;  %v545_v58 = vadd.f32 %v543_v47, %v539_v49  ;;  %v546_v62 = vadd.f32 %v544_v57, %v540_v55  ;;  %1390 = vpow2.f32 %v489_v53  ;;  %v556_v2 = vmul.f32 %v1706_v52, %v554_v60  ;;  %s1980_s17 = sld [smem:[#allocation2 + $0x2e]] }
  0x69   : > { %v346_v61 = vadd.f32 1.0, %v1854_v50  ;;  %1392 = vpow2.f32 %v491_v56  ;;  %v592_v4 = vstv %s1846_s24  ;;  %v340_v5 = vmul.f32 -0.5, %v1838_v25  ;;  %s2006_s18 = sld [smem:[#allocation2 + $0x2f]] }
  0x6a   : > { %v551_v3 = vadd.f32 %v549_v63, %v545_v58  ;;  %v552_v6 = vadd.f32 %v550_v0, %v546_v62  ;;  %v560_v7 = vstv %s1850_s25  ;;  %v349_v9 = vmul.f32 -0.5, %v1854_v50  ;;  %s2025_s19 = sld [smem:[#allocation2 + $0x35]] }
  0x6b   : > { %v596_v12 = vstv %s1852_s26  ;;  %1394 = vlog2.f32 %v346_v61  ;;  %v593_v22 = vmul.f32 %v592_v4, %v1630_v16  ;;  %v594_v28 = vmul.f32 %v592_v4, %v1633_v17  ;;  %s2034_s20 = sld [smem:[#allocation2 + $0x36]] }
  0x6c   : > { %v557_v10 = vadd.f32 %v555_v1, %v551_v3  ;;  %v558_v15 = vadd.f32 %v556_v2, %v552_v6  ;;  %v597_v23 = vmul.f32 %v1636_v18, %v596_v12  ;;  %v598_v29 = vmul.f32 %v1639_v19, %v596_v12  ;;  %s2037_s21 = sld [smem:[#allocation2 + $0x37]] }
  0x6d   : > { %v1871_v8 = vpop.eup %1384  ;;  %v602_v30 = vstv %s1857_s27  ;;  %v341_v33 = vadd.f32 1.0, %v340_v5  ;;  %v343_v34 = vand.u32 2147483647, %v1838_v25  ;;  %v350_v36 = vadd.f32 1.0, %v349_v9  ;;  %s2054_s22 = sld [smem:[#allocation2 + $0x38]] }
  0x6e   : > { %v1875_v13 = vpop.eup %1386  ;;  %v1881_v24 = vadd.f32 %v560_v7, %v557_v10  ;;  %v1889_v35 = vadd.f32 %v560_v7, %v558_v15  ;;  %v415_v40 = vadd.f32 1.0, %v1871_v8  ;;  %v608_v45 = vstv %s1863_s28  ;;  %s2062_s23 = sld [smem:[#allocation2 + $0x39]] }
  0x6f   : > { %v424_v46 = vadd.f32 1.0, %v1875_v13  ;;  %v599_v49 = vadd.f32 %v597_v23, %v593_v22  ;;  %v603_v53 = vmul.f32 %v1644_v20, %v602_v30  ;;  %v418_v55 = vmul.f32 -0.5, %v1871_v8  ;;  %s2068_s24 = sld [smem:[#allocation2 + $0x3a]] }
  0x70   : > { %v563_v41 = vmin.f32 %v1881_v24, 20.0  ;;  %v564_v47 = vmin.f32 %v1889_v35, 20.0  ;;  %v427_v56 = vmul.f32 -0.5, %v1875_v13  ;;  %v600_v57 = vadd.f32 %v598_v29, %v594_v28  ;;  %s2077_s25 = sld [smem:[#allocation2 + $0x3b]] }
  0x71   : > { %v604_v58 = vmul.f32 %v1647_v21, %v602_v30  ;;  %v352_v59 = vand.u32 2147483647, %v1854_v50  ;;  %v609_v60 = vmul.f32 %v1656_v26, %v608_v45  ;;  %v1911_v62 = vmul.f32 %v1838_v25, %v341_v33  ;;  %s2085_s26 = sld [smem:[#allocation2 + $0x3c]] }
  0x72   : > { %vm1913_vm0 = vcmp.lt.f32.partialorder %v343_v34, 0.0004427343  ;;  %v1918_v0 = vmul.f32 %v1854_v50, %v350_v36  ;;  %1396 = vlog2.f32 %v415_v40  ;;  %v567_v1 = vmul.f32 1.442695, %v563_v41  ;;  %s2096_s27 = sld [smem:[#allocation2 + $0x3d]] }
  0x73   : > { %v421_v2 = vand.u32 2147483647, %v1871_v8  ;;  %1398 = vlog2.f32 %v424_v46  ;;  %v569_v3 = vmul.f32 1.442695, %v564_v47  ;;  %v605_v4 = vadd.f32 %v603_v53, %v599_v49  ;;  %s2109_s28 = sld [smem:[#allocation2 + $0x4e]] }
  0x74   : > { %v1389_v61 = vpop.eup %1388  ;;  %v419_v5 = vadd.f32 1.0, %v418_v55  ;;  %v428_v6 = vadd.f32 1.0, %v427_v56  ;;  %1400 = vpow2.f32 %v567_v1  ;;  %v606_v50 = vadd.f32 %v604_v58, %v600_v57 }
  0x75   : > { %v1923_v25 = vpop.eup %1390  ;;  %v339_v9 = vmul.f32 0.6931472, %v1389_v61  ;;  %vm1927_vm1 = vcmp.lt.f32.partialorder %v352_v59, 0.0004427343  ;;  %1402 = vpow2.f32 %v569_v3  ;;  %v610_v12 = vmul.f32 %v1659_v27, %v608_v45 }
  0x76   : > { %v1925_v7 = vpop.eup %1392  ;;  %v611_v15 = vadd.f32 %v609_v60, %v605_v4  ;;  %vm331_vm2 = vcmp.gt.f32.partialorder %v1746_v37, 20.0  ;;  %v614_v22 = vstv %s1879_s29  ;;  %v620_v23 = vstv %s1886_s30  ;;  %s2114_s29 = sld [smem:[#allocation2 + $0x3e]] }
  0x77   : > { %v626_v28 = vstv %s1891_s3  ;;  %v632_v29 = vstv %s1896_s4  ;;  %v612_v30 = vadd.f32 %v610_v12, %v606_v50  ;;  %v615_v33 = vmul.f32 %v1666_v31, %v614_v22  ;;  %s2118_s30 = sld [smem:[#allocation2 + $0x3f]] }
  0x78   : > { %v616_v34 = vmul.f32 %v1669_v32, %v614_v22  ;;  %v621_v36 = vmul.f32 %v1678_v38, %v620_v23  ;;  %v1395_v40 = vpop.eup %1394  ;;  %v493_v41 = vadd.f32 1.0, %v1923_v25  ;;  %v502_v45 = vadd.f32 1.0, %v1925_v7  ;;  %s2131_s3 = sld [smem:[#allocation2 + $0x40]] }
  0x79   : > { %v622_v46 = vmul.f32 %v1681_v39, %v620_v23  ;;  %v627_v47 = vmul.f32 %v1689_v43, %v626_v28  ;;  %vm332_vm3 = vcmp.gt.f32.partialorder %v1760_v54, 20.0  ;;  %v617_v49 = vadd.f32 %v615_v33, %v611_v15  ;;  %s2136_s4 = sld [smem:[#allocation2 + $0x42]] }
  0x7a   : > { %v618_v53 = vadd.f32 %v616_v34, %v612_v30  ;;  %v628_v55 = vmul.f32 %v1696_v48, %v626_v28  ;;  %v633_v56 = vmul.f32 %v1703_v51, %v632_v29  ;;  %v634_v57 = vmul.f32 %v1706_v52, %v632_v29 }
  0x7b   : > { %v670_v58 = vstv %s1904_s5  ;;  %v674_v59 = vstv %s1908_s6  ;;  %v680_v60 = vstv %s1920_s7  ;;  %v623_v61 = vadd.f32 %v621_v36, %v617_v49  ;;  %s2142_s5 = sld [smem:[#allocation2 + $0x43]] }
  0x7c   : > { %v624_v1 = vadd.f32 %v622_v46, %v618_v53  ;;  %v671_v3 = vmul.f32 %v670_v58, %v1630_v16  ;;  %v672_v4 = vmul.f32 %v670_v58, %v1633_v17  ;;  %v348_v50 = vmul.f32 0.6931472, %v1395_v40  ;;  %s2145_s6 = sld [smem:[#allocation2 + $0x41]] }
  0x7d   : > { %1404 = vlog2.f32 %v493_v41  ;;  %v675_v12 = vmul.f32 %v1636_v18, %v674_v59  ;;  %v676_v15 = vmul.f32 %v1639_v19, %v674_v59  ;;  %v345_v22 = vsel %vm1913_vm0, %v1911_v62, %v339_v9  ;;  %s2154_s7 = sld [smem:[#allocation2 + $0x44]] }
  0x7e   : > { %1406 = vlog2.f32 %v502_v45  ;;  %v629_v23 = vadd.f32 %v627_v47, %v623_v61  ;;  %v630_v28 = vadd.f32 %v628_v55, %v624_v1  ;;  %v638_v29 = vstv %s1932_s8  ;;  %s2159_s8 = sld [smem:[#allocation2 + $0x48]] }
  0x7f   : > { %v681_v30 = vmul.f32 %v1644_v20, %v680_v60  ;;  %v682_v16 = vmul.f32 %v1647_v21, %v680_v60  ;;  %v686_v33 = vstv %s1939_s14  ;;  %v1397_v17 = vpop.eup %1396  ;;  %v677_v40 = vadd.f32 %v675_v12, %v671_v3  ;;  %s2165_s14 = sld [smem:[#allocation2 + $0x49]] }
  0x80   : > { %v635_v34 = vadd.f32 %v633_v56, %v629_v23  ;;  %v636_v36 = vadd.f32 %v634_v57, %v630_v28  ;;  %v678_v18 = vadd.f32 %v676_v15, %v672_v4  ;;  %v1399_v19 = vpop.eup %1398  ;;  %v354_v62 = vsel %vm1927_vm1, %v1918_v0, %v348_v50 }
  0x81   : > { %v1974_v63 = vmul.f32 %v1871_v8, %v419_v5  ;;  %v1977_v20 = vmul.f32 %v1875_v13, %v428_v6  ;;  %v430_v21 = vand.u32 2147483647, %v1875_v13  ;;  %v1982_v9 = vpop.eup %1400  ;;  %v1987_v41 = vsel %vm331_vm2, %v1746_v37, %v345_v22 }
  0x82   : > { %v496_v10 = vmul.f32 -0.5, %v1923_v25  ;;  %v1990_v0 = vadd.f32 %v638_v29, %v635_v34  ;;  %v1992_v5 = vadd.f32 %v638_v29, %v636_v36  ;;  %v1994_v45 = vpop.eup %1402  ;;  %vm1998_vm4 = vcmp.lt.f32.partialorder %v421_v2, 0.0004427343 }
  0x83   : > { %v571_v6 = vadd.f32 1.0, %v1982_v9  ;;  %v687_v46 = vmul.f32 %v1656_v26, %v686_v33  ;;  %v688_v37 = vmul.f32 %v1659_v27, %v686_v33  ;;  %v692_v47 = vstv %s1955_s9  ;;  %s2168_s9 = sld [smem:[#allocation2 + $0x4f]] }
  0x84   : > { %v580_v49 = vadd.f32 1.0, %v1994_v45  ;;  %v641_v53 = vmin.f32 %v1990_v0, 20.0  ;;  %v683_v55 = vadd.f32 %v681_v30, %v677_v40  ;;  %v684_v56 = vadd.f32 %v682_v16, %v678_v18 }
  0x85   : > { %v2013_v8 = vsel %vm332_vm3, %v1760_v54, %v354_v62  ;;  %vm2015_vm5 = vcmp.lt.f32.partialorder %v430_v21, 0.0004427343  ;;  %v499_v26 = vand.u32 2147483647, %v1923_v25  ;;  %1408 = vlog2.f32 %v571_v6 }
  0x86   : > { %v642_v27 = vmin.f32 %v1992_v5, 20.0  ;;  %vm409_vm6 = vcmp.gt.f32.partialorder %v1800_v42, 20.0  ;;  %v508_v57 = vand.u32 2147483647, %v1925_v7  ;;  %1410 = vlog2.f32 %v580_v49 }
  0x87   : > { %v693_v58 = vmul.f32 %v1666_v31, %v692_v47  ;;  %v694_v54 = vmul.f32 %v1669_v32, %v692_v47  ;;  %v497_v59 = vadd.f32 1.0, %v496_v10  ;;  %v505_v60 = vmul.f32 -0.5, %v1925_v7 }
  0x88   : > { %v645_v61 = vmul.f32 1.442695, %v641_v53  ;;  %v647_v1 = vmul.f32 1.442695, %v642_v27  ;;  %vm410_vm7 = vcmp.gt.f32.partialorder %v1802_v44, 20.0  ;;  %v689_v4 = vadd.f32 %v687_v46, %v683_v55 }
  0x89   : > { %v417_v3 = vmul.f32 0.6931472, %v1397_v17  ;;  %v690_v50 = vadd.f32 %v688_v37, %v684_v56  ;;  %v698_v12 = vstv %s1968_s15  ;;  %vm487_vm8 = vcmp.gt.f32.partialorder %v1826_v11, 20.0  ;;  %s2171_s15 = sld [smem:[#allocation2 + $0x45]] }
  0x8a   : > { %1412 = vpow2.f32 %v645_v61  ;;  %v699_v31 = vmul.f32 %v1678_v38, %v698_v12  ;;  %v700_v32 = vmul.f32 %v1681_v39, %v698_v12  ;;  %v704_v15 = vstv %s1980_s17  ;;  %v1405_v22 = vpop.eup %1404  ;;  %s2190_s17 = sld [smem:[#allocation2 + $0x46]] }
  0x8b   : > { %1414 = vpow2.f32 %v647_v1  ;;  %v695_v23 = vadd.f32 %v693_v58, %v689_v4  ;;  %v696_v28 = vadd.f32 %v694_v54, %v690_v50  ;;  %v705_v29 = vmul.f32 %v1689_v43, %v704_v15  ;;  %v1407_v30 = vpop.eup %1406 }
  0x8c   : > { %v426_v16 = vmul.f32 0.6931472, %v1399_v19  ;;  %v506_v33 = vadd.f32 1.0, %v505_v60  ;;  %v706_v17 = vmul.f32 %v1696_v48, %v704_v15  ;;  %v710_v34 = vstv %s2006_s18  ;;  %s2201_s18 = sld [smem:[#allocation2 + $0x4a]] }
  0x8d   : > { %vm488_vm9 = vcmp.gt.f32.partialorder %v1830_v14, 20.0  ;;  %v701_v38 = vadd.f32 %v699_v31, %v695_v23  ;;  %v702_v39 = vadd.f32 %v700_v32, %v696_v28  ;;  %v711_v36 = vmul.f32 %v1703_v51, %v710_v34 }
  0x8e   : > { %v712_v40 = vmul.f32 %v1706_v52, %v710_v34  ;;  %v495_v18 = vmul.f32 0.6931472, %v1405_v22  ;;  %v498_v43 = vmul.f32 %v1923_v25, %v497_v59  ;;  %v574_v62 = vmul.f32 -0.5, %v1982_v9 }
  0x8f   : > { %v583_v19 = vmul.f32 -0.5, %v1994_v45  ;;  %v423_v48 = vsel %vm1998_vm4, %v1974_v63, %v417_v3  ;;  %vm2050_vm10 = vcmp.lt.f32.partialorder %v499_v26, 0.0004427343  ;;  %v707_v10 = vadd.f32 %v705_v29, %v701_v38 }
  0x90   : > { %v708_v6 = vadd.f32 %v706_v17, %v702_v39  ;;  %v504_v51 = vmul.f32 0.6931472, %v1407_v30  ;;  %v507_v52 = vmul.f32 %v1925_v7, %v506_v33  ;;  %vm2057_vm11 = vcmp.lt.f32.partialorder %v508_v57, 0.0004427343 }
  0x91   : > { %v716_v46 = vstv %s2025_s19  ;;  %v432_v63 = vsel %vm2015_vm5, %v1977_v20, %v426_v16  ;;  %v577_v13 = vand.u32 2147483647, %v1982_v9  ;;  %v713_v37 = vadd.f32 %v711_v36, %v707_v10  ;;  %s2209_s19 = sld [smem:[#allocation2 + $0x4b]] }
  0x92   : > { %v714_v47 = vadd.f32 %v712_v40, %v708_v6  ;;  %v2073_v7 = vsel %vm409_vm6, %v1800_v42, %v423_v48  ;;  %v501_v49 = vsel %vm2050_vm10, %v498_v43, %v495_v18  ;;  %v575_v53 = vadd.f32 1.0, %v574_v62  ;;  %v1409_v56 = vpop.eup %1408 }
  0x93   : > { %v584_v55 = vadd.f32 1.0, %v583_v19  ;;  %v2079_v20 = vadd.f32 %v716_v46, %v713_v37  ;;  %v748_v26 = vstv %s2034_s20  ;;  %v752_v27 = vstv %s2037_s21  ;;  %v1411_v57 = vpop.eup %1410  ;;  %s2221_s20 = sld [smem:[#allocation2 + $0x47]] }
  0x94   : > { %v2081_v2 = vadd.f32 %v716_v46, %v714_v47  ;;  %v2090_v42 = vsel %vm410_vm7, %v1802_v44, %v432_v63  ;;  %v510_v58 = vsel %vm2057_vm11, %v507_v52, %v504_v51  ;;  %vm565_vm12 = vcmp.gt.f32.partialorder %v1881_v24, 20.0  ;;  %s2226_s21 = sld [smem:[#allocation2 + $0x50]] }
  0x95   : > { %v586_v54 = vand.u32 2147483647, %v1994_v45  ;;  %v2101_v59 = vsel %vm487_vm8, %v1826_v11, %v501_v49  ;;  %vm2103_vm13 = vcmp.lt.f32.partialorder %v577_v13, 0.0004427343  ;;  %v719_v44 = vmin.f32 %v2079_v20, 20.0 }
  0x96   : > { %v720_v61 = vmin.f32 %v2081_v2, 20.0  ;;  %v573_v1 = vmul.f32 0.6931472, %v1409_v56  ;;  %v576_v3 = vmul.f32 %v1982_v9, %v575_v53  ;;  %v749_v4 = vmul.f32 %v748_v26, %v1987_v41 }
  0x97   : > { %v753_v50 = vmul.f32 %v752_v27, %v2073_v7  ;;  %v1413_v11 = vpop.eup %1412  ;;  %v582_v12 = vmul.f32 0.6931472, %v1411_v57  ;;  %v585_v31 = vmul.f32 %v1994_v45, %v584_v55  ;;  %v723_v32 = vmul.f32 1.442695, %v719_v44 }
  0x98   : > { %v758_v15 = vstv %s2054_s22  ;;  %v1415_v22 = vpop.eup %1414  ;;  %v2123_v23 = vsel %vm488_vm9, %v1830_v14, %v510_v58  ;;  %vm2125_vm14 = vcmp.lt.f32.partialorder %v586_v54, 0.0004427343  ;;  %v649_v28 = vadd.f32 1.0, %v1413_v11  ;;  %s2233_s22 = sld [smem:[#allocation2 + $0x4c]] }
  0x99   : > { %v725_v29 = vmul.f32 1.442695, %v720_v61  ;;  %v658_v30 = vadd.f32 1.0, %v1415_v22  ;;  %1416 = vpow2.f32 %v723_v32  ;;  %v750_v45 = vmul.f32 %v748_v26, %v2013_v8 }
  0x9a   : > { %v754_v16 = vmul.f32 %v752_v27, %v2090_v42  ;;  %v579_v14 = vsel %vm2103_vm13, %v576_v3, %v573_v1  ;;  %1418 = vlog2.f32 %v649_v28  ;;  %v755_v33 = vadd.f32 %v753_v50, %v749_v4 }
  0x9b   : > { %v759_v17 = vmul.f32 %v758_v15, %v2101_v59  ;;  %vm566_vm15 = vcmp.gt.f32.partialorder %v1889_v35, 20.0  ;;  %v588_v34 = vsel %vm2125_vm14, %v585_v31, %v582_v12  ;;  %1420 = vlog2.f32 %v658_v30 }
  0x9c   : > { %v814_v38 = vstv %s2085_s26  ;;  %v652_v39 = vmul.f32 -0.5, %v1413_v11  ;;  %v661_v36 = vmul.f32 -0.5, %v1415_v22  ;;  %1422 = vpow2.f32 %v725_v29  ;;  %s2288_s26 = sld [smem:[#allocation2 + $0x51]] }
  0x9d   : > { %v818_v40 = vstv %s2096_s27  ;;  %v2150_v18 = vsel %vm565_vm12, %v1881_v24, %v579_v14  ;;  %v756_v43 = vadd.f32 %v754_v16, %v750_v45  ;;  %v760_v62 = vmul.f32 %v758_v15, %v2123_v23  ;;  %s2351_s27 = sld [smem:[#allocation2 + $0x54]] }
  0x9e   : > { %v764_v19 = vstv %s2062_s23  ;;  %v2157_v48 = vsel %vm566_vm15, %v1889_v35, %v588_v34  ;;  %v761_v21 = vadd.f32 %v759_v17, %v755_v33  ;;  %v815_v10 = vmul.f32 %v814_v38, %v1987_v41  ;;  %s2253_s23 = sld [smem:[#allocation2 + $0x4d]] }
  0x9f   : > { %v816_v24 = vmul.f32 %v814_v38, %v2013_v8  ;;  %v819_v6 = vmul.f32 %v818_v40, %v2073_v7  ;;  %v820_v51 = vmul.f32 %v818_v40, %v2090_v42  ;;  %v653_v35 = vadd.f32 1.0, %v652_v39 }
  0xa0   : > { %v655_v52 = vand.u32 2147483647, %v1413_v11  ;;  %v662_v25 = vadd.f32 1.0, %v661_v36  ;;  %v765_v46 = vmul.f32 %v764_v19, %v2150_v18  ;;  %v664_v63 = vand.u32 2147483647, %v1415_v22 }
  0xa1   : > { %v762_v13 = vadd.f32 %v760_v62, %v756_v43  ;;  %v766_v37 = vmul.f32 %v764_v19, %v2157_v48  ;;  %v770_v47 = vstv %s2068_s24  ;;  %v776_v49 = vstv %s2077_s25  ;;  %s2347_s24 = sld [smem:[#allocation2 + $0x52]] }
  0xa2   : > { %v824_v53 = vstv %s2114_s29  ;;  %v830_v55 = vstv %s2118_s30  ;;  %v782_v56 = vstv %s2109_s28  ;;  %v821_v26 = vadd.f32 %v819_v6, %v815_v10  ;;  %s2349_s25 = sld [smem:[#allocation2 + $0x53]] }
  0xa3   : > { %v880_v27 = vstv %s2136_s4  ;;  %v884_v57 = vstv %s2142_s5  ;;  %v2180_v58 = vmul.f32 %v1413_v11, %v653_v35  ;;  %vm2182_vm0 = vcmp.lt.f32.partialorder %v655_v52, 0.0004427343  ;;  %s2353_s28 = sld [smem:[#allocation2 + $0x55]] }
  0xa4   : > { %v2186_v60 = vmul.f32 %v1415_v22, %v662_v25  ;;  %v2188_v44 = vadd.f32 %v765_v46, %v761_v21  ;;  %v822_v61 = vadd.f32 %v820_v51, %v816_v24  ;;  %vm2192_vm1 = vcmp.lt.f32.partialorder %v664_v63, 0.0004427343  ;;  %s2355_s29 = sld [smem:[#allocation2 + $0x5a]] }
  0xa5   : > { %v2196_v3 = vadd.f32 %v766_v37, %v762_v13  ;;  %v825_v4 = vmul.f32 %v824_v53, %v2101_v59  ;;  %v826_v50 = vmul.f32 %v824_v53, %v2123_v23  ;;  %v831_v11 = vmul.f32 %v830_v55, %v2150_v18  ;;  %s2357_s30 = sld [smem:[#allocation2 + $0x56]] }
  0xa6   : > { %v2203_v12 = vpop.eup %1416  ;;  %v881_v31 = vmul.f32 %v880_v27, %v1987_v41  ;;  %v882_v32 = vmul.f32 %v880_v27, %v2013_v8  ;;  %v885_v15 = vmul.f32 %v884_v57, %v2073_v7  ;;  %v890_v22 = vstv %s2154_s7  ;;  %s2361_s4 = sld [smem:[#allocation2 + $0x58]] }
  0xa7   : > { %v1419_v9 = vpop.eup %1418  ;;  %vm643_vm2 = vcmp.gt.f32.partialorder %v1990_v0, 20.0  ;;  %v727_v28 = vadd.f32 1.0, %v2203_v12  ;;  %v886_v29 = vmul.f32 %v884_v57, %v2090_v42  ;;  %v946_v30 = vstv %s2159_s8  ;;  %s2365_s5 = sld [smem:[#allocation2 + $0x59]] }
  0xa8   : > { %v950_v45 = vstv %s2165_s14  ;;  %v1421_v16 = vpop.eup %1420  ;;  %vm644_vm3 = vcmp.gt.f32.partialorder %v1992_v5, 20.0  ;;  %v832_v14 = vmul.f32 %v830_v55, %v2157_v48  ;;  %v836_v33 = vstv %s2131_s3  ;;  %s2359_s3 = sld [smem:[#allocation2 + $0x57]] }
  0xa9   : > { %v842_v17 = vstv %s2145_s6  ;;  %v848_v34 = vstv %s2168_s9  ;;  %v2223_v38 = vpop.eup %1422  ;;  %1424 = vlog2.f32 %v727_v28  ;;  %v827_v39 = vadd.f32 %v825_v4, %v821_v26  ;;  %s2459_s6 = sld [smem:[#allocation2 + $0x5b]]  ;;  %s1232_s9 = sshll.u32 %s1221_s12, 1 }
  0xaa   : > { %v828_v36 = vadd.f32 %v826_v50, %v822_v61  ;;  %v896_v40 = vstv %s2171_s15  ;;  %v736_v43 = vadd.f32 1.0, %v2223_v38  ;;  %v891_v62 = vmul.f32 %v890_v22, %v2101_v59  ;;  %s2529_s7 = sld [smem:[#allocation2 + $0x5c]]  ;;  %p251_p4 = scmp.lt.s32.totalorder %s1232_s9, 5 }
  0xab   : > { %v947_v19 = vmul.f32 %v946_v30, %v1987_v41  ;;  %v951_v21 = vmul.f32 %v950_v45, %v2073_v7  ;;  %v651_v10 = vmul.f32 0.6931472, %v1419_v9  ;;  %v887_v24 = vadd.f32 %v885_v15, %v881_v31  ;;  %s2531_s8 = sld [smem:[#allocation2 + $0x5d]] }
  0xac   : > { %v888_v6 = vadd.f32 %v886_v29, %v882_v32  ;;  %v892_v51 = vmul.f32 %v890_v22, %v2123_v23  ;;  %v660_v35 = vmul.f32 0.6931472, %v1421_v16  ;;  %1426 = vlog2.f32 %v736_v43  ;;  %s2533_s14 = sld [smem:[#allocation2 + $0x5e]]  ;;  %s2635_s9 = smov (!%p251_p4, %s1232_s9), 5 }
  0xad   : > { %v948_v52 = vmul.f32 %v946_v30, %v2013_v8  ;;  %v952_v25 = vmul.f32 %v950_v45, %v2090_v42  ;;  %v730_v46 = vmul.f32 -0.5, %v2203_v12  ;;  %v833_v63 = vadd.f32 %v831_v11, %v827_v39  ;;  %s1233_s15 = sshll.u32 %s2635_s9, 3 }
  0xae   : > { %v902_v41 = vstv %s2190_s17  ;;  %v956_v13 = vstv %s2201_s18  ;;  %v897_v7 = vmul.f32 %v896_v40, %v2150_v18  ;;  %v898_v37 = vmul.f32 %v896_v40, %v2157_v48 }
  0xaf   : > { %v953_v53 = vadd.f32 %v951_v21, %v947_v19  ;;  %v962_v55 = vstv %s2209_s19  ;;  %v657_v26 = vsel %vm2182_vm0, %v2180_v58, %v651_v10  ;;  %vm721_vm4 = vcmp.gt.f32.partialorder %v2079_v20, 20.0  ;;  %s254_s19 = scalar_lea.vmem %s2581_s2, %s1233_s15 }
  0xb0   : > { %v739_v8 = vmul.f32 -0.5, %v2223_v38  ;;  %v893_v42 = vadd.f32 %v891_v62, %v887_v24  ;;  %v894_v27 = vadd.f32 %v892_v51, %v888_v6  ;;  %v666_v57 = vsel %vm2192_vm1, %v2186_v60, %v660_v35 }
  0xb1   : > { %v954_v61 = vadd.f32 %v952_v25, %v948_v52  ;;  %v957_v4 = vmul.f32 %v956_v13, %v2101_v59  ;;  %v958_v50 = vmul.f32 %v956_v13, %v2123_v23  ;;  %v731_v54 = vadd.f32 1.0, %v730_v46 }
  0xb2   : > { %v834_v58 = vadd.f32 %v832_v14, %v828_v36  ;;  %v908_v11 = vstv %s2221_s20  ;;  %v914_v31 = vstv %s2226_s21  ;;  %v667_v32 = vsel %vm643_vm2, %v1990_v0, %v657_v26 }
  0xb3   : > { %vm722_vm5 = vcmp.gt.f32.partialorder %v2081_v2, 20.0  ;;  %v733_v60 = vand.u32 2147483647, %v2203_v12  ;;  %v959_v1 = vadd.f32 %v957_v4, %v953_v53  ;;  %v963_v59 = vmul.f32 %v962_v55, %v2150_v18 }
  0xb4   : > { %v668_v23 = vsel %vm644_vm3, %v1992_v5, %v666_v57  ;;  %v740_v15 = vadd.f32 1.0, %v739_v8  ;;  %v742_v22 = vand.u32 2147483647, %v2223_v38  ;;  %v968_v9 = vstv %s2233_s22 }
  0xb5   : > { %v899_v28 = vadd.f32 %v897_v7, %v893_v42  ;;  %v900_v29 = vadd.f32 %v898_v37, %v894_v27  ;;  %v960_v0 = vadd.f32 %v958_v50, %v954_v61  ;;  %v964_v30 = vmul.f32 %v962_v55, %v2157_v48 }
  0xb6   : > { %v732_v45 = vmul.f32 %v2203_v12, %v731_v54  ;;  %v771_v16 = vmul.f32 %v770_v47, %v667_v32  ;;  %v837_v18 = vmul.f32 %v836_v33, %v667_v32  ;;  %v903_v14 = vmul.f32 %v902_v41, %v667_v32  ;;  %v1425_v39 = vpop.eup %1424 }
  0xb7   : > { %vm2274_vm6 = vcmp.lt.f32.partialorder %v733_v60, 0.0004427343  ;;  %v772_v36 = vmul.f32 %v770_v47, %v668_v23  ;;  %v965_v40 = vadd.f32 %v963_v59, %v959_v1  ;;  %v969_v43 = vmul.f32 %v968_v9, %v667_v32 }
  0xb8   : > { %v729_v62 = vmul.f32 0.6931472, %v1425_v39  ;;  %v741_v48 = vmul.f32 %v2223_v38, %v740_v15  ;;  %vm2281_vm7 = vcmp.lt.f32.partialorder %v742_v22, 0.0004427343  ;;  %v838_v19 = vmul.f32 %v836_v33, %v668_v23 }
  0xb9   : > { %v904_v21 = vmul.f32 %v902_v41, %v668_v23  ;;  %v966_v10 = vadd.f32 %v964_v30, %v960_v0  ;;  %v970_v24 = vmul.f32 %v968_v9, %v668_v23  ;;  %v974_v6 = vstv %s2253_s23  ;;  %v1427_v47 = vpop.eup %1426 }
  0xba   : > { %v735_v51 = vsel %vm2274_vm6, %v732_v45, %v729_v62  ;;  %v773_v38 = vadd.f32 %v771_v16, %v2188_v44  ;;  %v839_v35 = vadd.f32 %v837_v18, %v833_v63  ;;  %v905_v52 = vadd.f32 %v903_v14, %v899_v28 }
  0xbb   : > { %v738_v25 = vmul.f32 0.6931472, %v1427_v47  ;;  %v745_v33 = vsel %vm721_vm4, %v2079_v20, %v735_v51  ;;  %v774_v46 = vadd.f32 %v772_v36, %v2196_v3  ;;  %v971_v41 = vadd.f32 %v969_v43, %v965_v40 }
  0xbc   : > { %v777_v13 = vmul.f32 %v776_v49, %v745_v33  ;;  %v843_v7 = vmul.f32 %v842_v17, %v745_v33  ;;  %v909_v37 = vmul.f32 %v908_v11, %v745_v33  ;;  %v975_v44 = vmul.f32 %v974_v6, %v745_v33 }
  0xbd   : > { %v744_v63 = vsel %vm2281_vm7, %v741_v48, %v738_v25  ;;  %v840_v53 = vadd.f32 %v838_v19, %v834_v58  ;;  %v906_v55 = vadd.f32 %v904_v21, %v900_v29  ;;  %v972_v26 = vadd.f32 %v970_v24, %v966_v10 }
  0xbe   : > { %v746_v20 = vsel %vm722_vm5, %v2081_v2, %v744_v63  ;;  %v779_v3 = vadd.f32 %v777_v13, %v773_v38  ;;  %v845_v8 = vadd.f32 %v843_v7, %v839_v35  ;;  %v911_v42 = vadd.f32 %v909_v37, %v905_v52 }
  0xbf   : > { %v778_v27 = vmul.f32 %v776_v49, %v746_v20  ;;  %v844_v57 = vmul.f32 %v842_v17, %v746_v20  ;;  %v910_v61 = vmul.f32 %v908_v11, %v746_v20  ;;  %v976_v4 = vmul.f32 %v974_v6, %v746_v20 }
  0xc0   : > { %v2312_v50 = vadd.f32 %v782_v56, %v779_v3  ;;  %v2316_v54 = vadd.f32 %v848_v34, %v845_v8  ;;  %v2320_v2 = vadd.f32 %v914_v31, %v911_v42  ;;  %v977_v58 = vadd.f32 %v975_v44, %v971_v41 }
  0xc1   : > { %v780_v32 = vadd.f32 %v778_v27, %v774_v46  ;;  %v846_v60 = vadd.f32 %v844_v57, %v840_v53  ;;  %v912_v1 = vadd.f32 %v910_v61, %v906_v55  ;;  %v980_v49 = vstv %s2288_s26 }
  0xc2   : > { %v785_v59 = vmin.f32 %v2312_v50, 20.0  ;;  %v851_v17 = vmin.f32 %v2316_v54, 20.0  ;;  %v978_v11 = vadd.f32 %v976_v4, %v972_v26  ;;  %v917_v9 = vmin.f32 %v2320_v2, 20.0 }
  0xc3   : > { %v2327_v23 = vadd.f32 %v782_v56, %v780_v32  ;;  %v2331_v15 = vadd.f32 %v848_v34, %v846_v60  ;;  %v2335_v22 = vadd.f32 %v914_v31, %v912_v1  ;;  %v2338_v0 = vadd.f32 %v980_v49, %v977_v58 }
  0xc4   : > { %v789_v28 = vmul.f32 1.442695, %v785_v59  ;;  %v855_v29 = vmul.f32 1.442695, %v851_v17  ;;  %v921_v16 = vmul.f32 1.442695, %v917_v9  ;;  %v2343_v14 = vadd.f32 %v980_v49, %v978_v11 }
  0xc5   : > { %v786_v30 = vmin.f32 %v2327_v23, 20.0  ;;  %v852_v45 = vmin.f32 %v2331_v15, 20.0  ;;  %v918_v56 = vmin.f32 %v2335_v22, 20.0  ;;  %v983_v39 = vmin.f32 %v2338_v0, 20.0 }
  0xc6   : > { %1428 = vpow2.f32 %v789_v28  ;;  %v984_v5 = vmin.f32 %v2343_v14, 20.0  ;;  %v1012_v51 = vstv %s2347_s24  ;;  %v1016_v38 = vstv %s2349_s25 }
  0xc7   : > { %v791_v18 = vmul.f32 1.442695, %v786_v30  ;;  %1430 = vpow2.f32 %v855_v29  ;;  %v857_v34 = vmul.f32 1.442695, %v852_v45  ;;  %v923_v31 = vmul.f32 1.442695, %v918_v56 }
  0xc8   : > { %1432 = vpow2.f32 %v921_v16  ;;  %v987_v36 = vmul.f32 1.442695, %v983_v39  ;;  %v989_v40 = vmul.f32 1.442695, %v984_v5  ;;  %v1022_v35 = vstv %s2351_s27 }
  0xc9   : > { %1434 = vpow2.f32 %v791_v18  ;;  %v1028_v25 = vstv %s2353_s28  ;;  %v1034_v33 = vstv %s2355_s29  ;;  %v1066_v46 = vstv %s2357_s30 }
  0xca   : > { %1436 = vpow2.f32 %v857_v34  ;;  %v1070_v37 = vstv %s2359_s3  ;;  %v1076_v53 = vstv %s2361_s4  ;;  %vm787_vm8 = vcmp.gt.f32.partialorder %v2312_v50, 20.0 }
  0xcb   : > { %1438 = vpow2.f32 %v923_v31  ;;  %v1082_v3 = vstv %s2365_s5  ;;  %vm853_vm9 = vcmp.gt.f32.partialorder %v2316_v54, 20.0  ;;  %vm788_vm11 = vcmp.gt.f32.partialorder %v2327_v23, 20.0 }
  0xcc   : > { %1440 = vpow2.f32 %v987_v36  ;;  %vm854_vm12 = vcmp.gt.f32.partialorder %v2331_v15, 20.0  ;;  %vm919_vm13 = vcmp.gt.f32.partialorder %v2320_v2, 20.0  ;;  %vm920_vm1 = vcmp.gt.f32.partialorder %v2335_v22, 20.0 }
  0xcd   : > { %1442 = vpow2.f32 %v989_v40  ;;  %vm985_vm4 = vcmp.gt.f32.partialorder %v2338_v0, 20.0  ;;  %vm986_vm5 = vcmp.gt.f32.partialorder %v2343_v14, 20.0 }
  0xd3   : > { %v1429_v43 = vpop.eup %1428 }
  0xd4   : > { %v2363_v62 = vpop.eup %1430  ;;  %v793_v48 = vadd.f32 1.0, %v1429_v43  ;;  %v796_v13 = vmul.f32 -0.5, %v1429_v43  ;;  %v799_v7 = vand.u32 2147483647, %v1429_v43 }
  0xd5   : > { %v2367_v12 = vpop.eup %1432  ;;  %v859_v19 = vadd.f32 1.0, %v2363_v62  ;;  %v862_v63 = vmul.f32 -0.5, %v2363_v62  ;;  %v865_v8 = vand.u32 2147483647, %v2363_v62 }
  0xd6   : > { %v1435_v21 = vpop.eup %1434  ;;  %1444 = vlog2.f32 %v793_v48  ;;  %v925_v6 = vadd.f32 1.0, %v2367_v12  ;;  %v928_v42 = vmul.f32 -0.5, %v2367_v12  ;;  %v797_v61 = vadd.f32 1.0, %v796_v13 }
  0xd7   : > { %v1437_v10 = vpop.eup %1436  ;;  %v802_v24 = vadd.f32 1.0, %v1435_v21  ;;  %1446 = vlog2.f32 %v859_v19  ;;  %v805_v44 = vmul.f32 -0.5, %v1435_v21  ;;  %vm2390_vm10 = vcmp.lt.f32.partialorder %v799_v7, 0.0004427343 }
  0xd8   : > { %v868_v47 = vadd.f32 1.0, %v1437_v10  ;;  %v1439_v52 = vpop.eup %1438  ;;  %v871_v26 = vmul.f32 -0.5, %v1437_v10  ;;  %v808_v58 = vand.u32 2147483647, %v1435_v21  ;;  %v863_v60 = vadd.f32 1.0, %v862_v63 }
  0xd9   : > { %1448 = vlog2.f32 %v802_v24  ;;  %v2377_v41 = vpop.eup %1440  ;;  %v934_v20 = vadd.f32 1.0, %v1439_v52  ;;  %v937_v27 = vmul.f32 -0.5, %v1439_v52  ;;  %v806_v32 = vadd.f32 1.0, %v805_v44 }
  0xda   : > { %1450 = vlog2.f32 %v868_v47  ;;  %v2382_v55 = vpop.eup %1442  ;;  %v991_v57 = vadd.f32 1.0, %v2377_v41  ;;  %v872_v49 = vadd.f32 1.0, %v871_v26  ;;  %v874_v59 = vand.u32 2147483647, %v1437_v10 }
  0xdb   : > { %1452 = vlog2.f32 %v925_v6  ;;  %v1000_v1 = vadd.f32 1.0, %v2382_v55  ;;  %v931_v17 = vand.u32 2147483647, %v2367_v12  ;;  %v929_v11 = vadd.f32 1.0, %v928_v42 }
  0xdc   : > { %1454 = vlog2.f32 %v934_v20  ;;  %v938_v9 = vadd.f32 1.0, %v937_v27  ;;  %v940_v28 = vand.u32 2147483647, %v1439_v52  ;;  %v798_v29 = vmul.f32 %v1429_v43, %v797_v61 }
  0xdd   : > { %1456 = vlog2.f32 %v991_v57  ;;  %vm2399_vm14 = vcmp.lt.f32.partialorder %v865_v8, 0.0004427343  ;;  %v994_v45 = vmul.f32 -0.5, %v2377_v41  ;;  %v1003_v56 = vmul.f32 -0.5, %v2382_v55 }
  0xde   : > { %1458 = vlog2.f32 %v1000_v1  ;;  %v807_v18 = vmul.f32 %v1435_v21, %v806_v32  ;;  %vm2405_vm15 = vcmp.lt.f32.partialorder %v808_v58, 0.0004427343  ;;  %v864_v31 = vmul.f32 %v2363_v62, %v863_v60 }
  0xdf   : > { %v997_v39 = vand.u32 2147483647, %v2377_v41  ;;  %v873_v40 = vmul.f32 %v1437_v10, %v872_v49  ;;  %vm2411_vm0 = vcmp.lt.f32.partialorder %v874_v59, 0.0004427343  ;;  %vm2416_vm2 = vcmp.lt.f32.partialorder %v931_v17, 0.0004427343 }
  0xe0   : > { %v930_v21 = vmul.f32 %v2367_v12, %v929_v11  ;;  %v939_v24 = vmul.f32 %v1439_v52, %v938_v9  ;;  %vm2421_vm3 = vcmp.lt.f32.partialorder %v940_v28, 0.0004427343  ;;  %v995_v47 = vadd.f32 1.0, %v994_v45 }
  0xe1   : > { %v1004_v13 = vadd.f32 1.0, %v1003_v56  ;;  %v1006_v7 = vand.u32 2147483647, %v2382_v55  ;;  %vm2435_vm6 = vcmp.lt.f32.partialorder %v997_v39, 0.0004427343 }
  0xe2   : > { %v996_v60 = vmul.f32 %v2377_v41, %v995_v47 }
  0xe3   : > { %v1445_v16 = vpop.eup %1444  ;;  %v1005_v1 = vmul.f32 %v2382_v55, %v1004_v13  ;;  %vm2481_vm7 = vcmp.lt.f32.partialorder %v1006_v7, 0.0004427343 }
  0xe4   : > { %v1447_v5 = vpop.eup %1446  ;;  %v795_v36 = vmul.f32 0.6931472, %v1445_v16 }
  0xe5   : > { %v861_v19 = vmul.f32 0.6931472, %v1447_v5 }
  0xe6   : > { %v1449_v10 = vpop.eup %1448  ;;  %v801_v6 = vsel %vm2390_vm10, %v798_v29, %v795_v36 }
  0xe7   : > { %v1451_v12 = vpop.eup %1450  ;;  %v804_v52 = vmul.f32 0.6931472, %v1449_v10  ;;  %v811_v44 = vsel %vm787_vm8, %v2312_v50, %v801_v6  ;;  %v867_v63 = vsel %vm2399_vm14, %v864_v31, %v861_v19 }
  0xe8   : > { %v1453_v20 = vpop.eup %1452  ;;  %v870_v8 = vmul.f32 0.6931472, %v1451_v12  ;;  %v877_v42 = vsel %vm853_vm9, %v2316_v54, %v867_v63  ;;  %v1013_v27 = vmul.f32 %v1012_v51, %v811_v44  ;;  %v1067_v50 = vmul.f32 %v1066_v46, %v811_v44 }
  0xe9   : > { %v810_v57 = vsel %vm2405_vm15, %v807_v18, %v804_v52  ;;  %v927_v61 = vmul.f32 0.6931472, %v1453_v20  ;;  %v1017_v4 = vmul.f32 %v1016_v38, %v877_v42  ;;  %v1071_v58 = vmul.f32 %v1070_v37, %v877_v42  ;;  %v1455_v49 = vpop.eup %1454 }
  0xea   : > { %v812_v32 = vsel %vm788_vm11, %v2327_v23, %v810_v57  ;;  %v876_v54 = vsel %vm2411_vm0, %v873_v40, %v870_v8  ;;  %v1457_v9 = vpop.eup %1456  ;;  %v936_v28 = vmul.f32 0.6931472, %v1455_v49 }
  0xeb   : > { %v878_v59 = vsel %vm854_vm12, %v2331_v15, %v876_v54  ;;  %v933_v17 = vsel %vm2416_vm2, %v930_v21, %v927_v61  ;;  %v1014_v23 = vmul.f32 %v1012_v51, %v812_v32  ;;  %v1019_v11 = vadd.f32 %v1017_v4, %v1013_v27  ;;  %v1459_v56 = vpop.eup %1458 }
  0xec   : > { %v943_v41 = vsel %vm919_vm13, %v2320_v2, %v933_v17  ;;  %v1018_v55 = vmul.f32 %v1016_v38, %v878_v59  ;;  %v1068_v29 = vmul.f32 %v1066_v46, %v812_v32  ;;  %v993_v30 = vmul.f32 0.6931472, %v1457_v9 }
  0xed   : > { %v1023_v15 = vmul.f32 %v1022_v35, %v943_v41  ;;  %v1072_v45 = vmul.f32 %v1070_v37, %v878_v59  ;;  %v1073_v51 = vadd.f32 %v1071_v58, %v1067_v50  ;;  %v942_v16 = vsel %vm2421_vm3, %v939_v24, %v936_v28 }
  0xee   : > { %v1020_v38 = vadd.f32 %v1018_v55, %v1014_v23  ;;  %v1077_v46 = vmul.f32 %v1076_v53, %v943_v41  ;;  %v944_v18 = vsel %vm920_vm1, %v2335_v22, %v942_v16  ;;  %v999_v37 = vsel %vm2435_vm6, %v996_v60, %v993_v30 }
  0xef   : > { %v1002_v34 = vmul.f32 0.6931472, %v1459_v56  ;;  %v1025_v31 = vadd.f32 %v1023_v15, %v1019_v11  ;;  %v1009_v39 = vsel %vm985_vm4, %v2338_v0, %v999_v37  ;;  %v1024_v5 = vmul.f32 %v1022_v35, %v944_v18 }
  0xf0   : > { %v1074_v36 = vadd.f32 %v1072_v45, %v1068_v29  ;;  %v1078_v40 = vmul.f32 %v1076_v53, %v944_v18  ;;  %v1029_v43 = vmul.f32 %v1028_v25, %v1009_v39  ;;  %v1079_v48 = vadd.f32 %v1077_v46, %v1073_v51 }
  0xf1   : > { %v1008_v22 = vsel %vm2481_vm7, %v1005_v1, %v1002_v34  ;;  %v1083_v19 = vmul.f32 %v1082_v3, %v1009_v39  ;;  %v1026_v0 = vadd.f32 %v1024_v5, %v1020_v38  ;;  %v1088_v35 = vstv %s2459_s6 }
  0xf2   : > { %v1010_v21 = vsel %vm986_vm5, %v2343_v14, %v1008_v22  ;;  %v1080_v24 = vadd.f32 %v1078_v40, %v1074_v36  ;;  %v1031_v10 = vadd.f32 %v1029_v43, %v1025_v31  ;;  %v1120_v51 = vstv %s2529_s7 }
  0xf3   : > { %v1030_v62 = vmul.f32 %v1028_v25, %v1010_v21  ;;  %v1084_v53 = vmul.f32 %v1082_v3, %v1010_v21  ;;  %v1085_v6 = vadd.f32 %v1083_v19, %v1079_v48  ;;  %v1124_v34 = vstv %s2531_s8 }
  0xf4   : > { %v2515_v13 = vadd.f32 %v1034_v33, %v1031_v10  ;;  %v1130_v10 = vstv %s2533_s14 }
  0xf5   : > { %v1032_v47 = vadd.f32 %v1030_v62, %v1026_v0  ;;  %v1086_v7 = vadd.f32 %v1084_v53, %v1080_v24  ;;  %v2517_v12 = vadd.f32 %v1088_v35, %v1085_v6 }
  0xf6   : > { %v1037_v14 = vmin.f32 %v2515_v13, 20.0  ;;  %vm1039_vm9 = vcmp.gt.f32.partialorder %v2515_v13, 20.0 }
  0xf7   : > { %v2521_v52 = vadd.f32 %v1034_v33, %v1032_v47  ;;  %v2524_v44 = vadd.f32 %v1088_v35, %v1086_v7  ;;  %v1091_v25 = vmin.f32 %v2517_v12, 20.0  ;;  %vm1093_vm12 = vcmp.gt.f32.partialorder %v2517_v12, 20.0 }
  0xf8   : > { %v1041_v3 = vmul.f32 1.442695, %v1037_v14 }
  0xf9   : > { %v1038_v63 = vmin.f32 %v2521_v52, 20.0  ;;  %v1092_v26 = vmin.f32 %v2524_v44, 20.0  ;;  %v1095_v20 = vmul.f32 1.442695, %v1091_v25  ;;  %vm1040_vm13 = vcmp.gt.f32.partialorder %v2521_v52, 20.0 }
  0xfa   : > { %1460 = vpow2.f32 %v1041_v3  ;;  %vm1094_vm14 = vcmp.gt.f32.partialorder %v2524_v44, 20.0 }
  0xfb   : > { %v1043_v8 = vmul.f32 1.442695, %v1038_v63  ;;  %v1097_v42 = vmul.f32 1.442695, %v1092_v26  ;;  %1462 = vpow2.f32 %v1095_v20 }
  0xfd   : > { %1464 = vpow2.f32 %v1043_v8 }
  0xfe   : > { %1466 = vpow2.f32 %v1097_v42 }
 0x107   : > { %v1461_v33 = vpop.eup %1460 }
 0x108   : > { %v1463_v27 = vpop.eup %1462  ;;  %v1045_v50 = vadd.f32 1.0, %v1461_v33  ;;  %v1048_v54 = vmul.f32 -0.5, %v1461_v33  ;;  %v1051_v17 = vand.u32 2147483647, %v1461_v33 }
 0x109   : > { %v1099_v61 = vadd.f32 1.0, %v1463_v27  ;;  %v1102_v60 = vmul.f32 -0.5, %v1463_v27  ;;  %v1105_v9 = vand.u32 2147483647, %v1463_v27 }
 0x10a   : > { %v1465_v57 = vpop.eup %1464  ;;  %1468 = vlog2.f32 %v1045_v50  ;;  %v1049_v49 = vadd.f32 1.0, %v1048_v54  ;;  %vm2535_vm8 = vcmp.lt.f32.partialorder %v1051_v17, 0.0004427343 }
 0x10b   : > { %v1467_v4 = vpop.eup %1466  ;;  %v1054_v58 = vadd.f32 1.0, %v1465_v57  ;;  %1470 = vlog2.f32 %v1099_v61  ;;  %v1057_v1 = vmul.f32 -0.5, %v1465_v57  ;;  %v1103_v23 = vadd.f32 1.0, %v1102_v60 }
 0x10c   : > { %v1108_v32 = vadd.f32 1.0, %v1467_v4  ;;  %v1111_v59 = vmul.f32 -0.5, %v1467_v4  ;;  %v1060_v28 = vand.u32 2147483647, %v1465_v57  ;;  %v1050_v41 = vmul.f32 %v1461_v33, %v1049_v49 }
 0x10d   : > { %1472 = vlog2.f32 %v1054_v58  ;;  %v1058_v11 = vadd.f32 1.0, %v1057_v1  ;;  %v1104_v15 = vmul.f32 %v1463_v27, %v1103_v23  ;;  %v1114_v45 = vand.u32 2147483647, %v1467_v4 }
 0x10e   : > { %1474 = vlog2.f32 %v1108_v32  ;;  %v1112_v55 = vadd.f32 1.0, %v1111_v59  ;;  %vm2541_vm10 = vcmp.lt.f32.partialorder %v1105_v9, 0.0004427343  ;;  %vm2545_vm11 = vcmp.lt.f32.partialorder %v1060_v28, 0.0004427343 }
 0x10f   : > { %v1059_v2 = vmul.f32 %v1465_v57, %v1058_v11  ;;  %vm1115_vm15 = vcmp.lt.f32.partialorder %v1114_v45, 0.0004427343 }
 0x110   : > { %v1113_v5 = vmul.f32 %v1467_v4, %v1112_v55 }
 0x117   : > { %v1469_v29 = vpop.eup %1468 }
 0x118   : > { %v1471_v56 = vpop.eup %1470  ;;  %v1047_v16 = vmul.f32 0.6931472, %v1469_v29 }
 0x119   : > { %v1101_v37 = vmul.f32 0.6931472, %v1471_v56 }
 0x11a   : > { %v1473_v46 = vpop.eup %1472  ;;  %v1053_v31 = vsel %vm2535_vm8, %v1050_v41, %v1047_v16 }
 0x11b   : > { %v1056_v39 = vmul.f32 0.6931472, %v1473_v46  ;;  %v1475_v36 = vpop.eup %1474  ;;  %v1063_v40 = vsel %vm1039_vm9, %v2515_v13, %v1053_v31  ;;  %v1107_v22 = vsel %vm2541_vm10, %v1104_v15, %v1101_v37 }
 0x11c   : > { %v1110_v48 = vmul.f32 0.6931472, %v1475_v36  ;;  %v1117_v19 = vsel %vm1093_vm12, %v2517_v12, %v1107_v22  ;;  %v1121_v21 = vmul.f32 %v1120_v51, %v1063_v40 }
 0x11d   : > { %v1062_v43 = vsel %vm2545_vm11, %v1059_v2, %v1056_v39  ;;  %v1125_v24 = vmul.f32 %v1124_v34, %v1117_v19 }
 0x11e   : > { %v1064_v0 = vsel %vm1040_vm13, %v2521_v52, %v1062_v43  ;;  %v1116_v35 = vsel %vm1115_vm15, %v1113_v5, %v1110_v48 }
 0x11f   : > { %v1122_v62 = vmul.f32 %v1120_v51, %v1064_v0  ;;  %v1118_v53 = vsel %vm1094_vm14, %v2524_v44, %v1116_v35  ;;  %v1127_v6 = vadd.f32 %v1125_v24, %v1121_v21 }
 0x120   : > { %v1126_v47 = vmul.f32 %v1124_v34, %v1118_v53 }
 0x121   : > { %v1131_v13 = vadd.f32 %v1130_v10, %v1127_v6 }
 0x122   : > { %v1128_v7 = vadd.f32 %v1126_v47, %v1122_v62 }
 0x123   : > { %v1133_v14 = vsub.f32 0.0, %v1131_v13 }
 0x124   : > { %v1132_v25 = vadd.f32 %v1130_v10, %v1128_v7 }
 0x125   : > { %v1135_v63 = vmul.f32 1.442695, %v1133_v14 }
 0x126   : > { %v1134_v3 = vsub.f32 0.0, %v1132_v25 }
 0x127   : > { %1476 = vpow2.f32 %v1135_v63 }
 0x128   : > { %v1137_v12 = vmul.f32 1.442695, %v1134_v3 }
 0x12a   : > { %1478 = vpow2.f32 %v1137_v12 }
 0x134   : > { %v1477_v26 = vpop.eup %1476 }
 0x135   : > { %v1139_v52 = vadd.f32 1.0, %v1477_v26 }
 0x137   : > { %v1479_v20 = vpop.eup %1478  ;;  %1480 = vrcp.f32 %v1139_v52 }
 0x138   : > { %v1140_v8 = vadd.f32 1.0, %v1479_v20 }
 0x13a   : > { %1482 = vrcp.f32 %v1140_v8 }
 0x144   : > { %v1481_v44 = vpop.eup %1480 }
 0x145   : > { %1145 = vst [vmem:[%s254_s19] sm:$0xff] %v1481_v44 }
 0x147   : > { %v1483_v42 = vpop.eup %1482 }
 0x148   : > { %1146 = vst [vmem:[%s254_s19 + $0x8] sm:$0xff] %v1483_v42 }
 0x149 PF: > { %p10_p6 = scmp.ge.s32.totalorder %s1560_s13, 5   ;;  %s2631_s9 = smov %s1521_s10 }
 0x14a   : > { %s2632_s10 = smov %s1570_s16  ;;  %s2633_s11 = smov %s1560_s13 }
 0x14b   :  { %12 = sbr.rel (!%p10_p6) target bundleno = 2 (0x2), region = 113 }
 0x150   :  { %1169 = vsyncpa [#allocation3], 1 }
 0x151   :  { %1171 = vsyncpa [#allocation3 + $0x1], 1 }

</bundles_post_ra>
